<compile_context>
chip_gen: v7x
topology: tpu7x:2x2x1
jax: 0.10.0
libtpu: 0.0.40
codegen_flags: <defaults>
</compile_context>

<pallas_src>
import functools

import jax
import jax.numpy as jnp
from jax.experimental import pallas as pl
from jax.experimental.pallas import tpu as pltpu


def _round_up(x, m):
    return (x + m - 1) // m * m


def _edges_gen_kernel(bos_token,
                      srci_ref, srcj_ref, feats_ref,
                      wbig_ref, bhn_ref, wout_ref, bout_ref,
                      out_ref):
    """One grid step = full seq_len greedy rollout for one tile of TM rows."""
    TM = srci_ref.shape[0]
    NB, Hp = feats_ref.shape
    seq_len, _, V = out_ref.shape

    col_v = jax.lax.broadcasted_iota(jnp.int32, (TM, V), 1)

    # ---- t = 0 -------------------------------------------------------------
    # hidden0[row] = features[i, b] - features[j, b], rebuilt via a +/-1
    # selection matmul against the tiny flattened features slab (exact, f32).
    col_nb = jax.lax.broadcasted_iota(jnp.int32, (TM, NB), 1)
    sel = ((col_nb == srci_ref[...]).astype(jnp.float32)
           - (col_nb == srcj_ref[...]).astype(jnp.float32))
    h0 = jnp.dot(sel, feats_ref[...], preferred_element_type=jnp.float32)
    # all_logits[0, :, bos] = 1.0
    out_ref[0] = (col_v == bos_token).astype(jnp.float32)

    # ---- t = 1 .. seq_len-1: GRU recurrence carried in (h, tok) ------------
    def step(t, carry):
        h, tok = carry
        # one-hot of previous token (exact in bf16); fused embedding lookup:
        # relu(E)[tok] @ W_ih (+ biases) == onehot @ table (tables precomputed).
        onehot = (col_v == tok).astype(jnp.bfloat16)
        x = jnp.concatenate([onehot, h.astype(jnp.bfloat16)], axis=-1)
        # single wide MXU dot: K = V + Hp, N = 4*Hp; all slices 128-aligned.
        g = jnp.dot(x, wbig_ref[...], preferred_element_type=jnp.float32)
        r = jax.nn.sigmoid(g[:, 0:Hp])                 # b_ir + b_hr in table
        z = jax.nn.sigmoid(g[:, Hp:2 * Hp])            # b_iz + b_hz in table
        gh_n = g[:, 3 * Hp:4 * Hp] + bhn_ref[...]      # b_hn stays inside r*()
        n = jnp.tanh(g[:, 2 * Hp:3 * Hp] + r * gh_n)   # b_in folded in table
        h_new = (1.0 - z) * n + z * h

        logits = (jnp.dot(h_new.astype(jnp.bfloat16), wout_ref[...],
                          preferred_element_type=jnp.float32) + bout_ref[...])
        out_ref[t] = logits

        # greedy feedback: index of the FIRST maximum (torch.max tie-break)
        mx = jnp.max(logits, axis=-1, keepdims=True)
        tok_new = jnp.min(jnp.where(logits >= mx, col_v, V),
                          axis=-1, keepdims=True)
        return h_new, tok_new

    tok0 = jnp.full((TM, 1), bos_token, jnp.int32)
    jax.lax.fori_loop(1, seq_len, step, (h0, tok0), unroll=(seq_len <= 16))


def edges_gen_forward(features, seq_len, params, bos_token, *, tm=128):
    N, B, H = features.shape
    Hp, V = params["wout_t"].shape
    NB = N * B
    M = N * N * B

    # Tile the flattened (i, j, b) row axis:
    #  * multiple of 16 (bf16 sublane packing),
    #  * >= 2 tiles whenever possible so the parallel m axis shards across both
    #    TensorCores on v7x,
    #  * resident (seq_len, tm, V) f32 output block kept under ~8 MiB/buffer
    #    (x2 buffers), safe under the 32 MiB scoped-VMEM default on v7x.
    tm = _round_up(max(tm, 16), 16)
    cap_megacore = _round_up(max((M + 1) // 2, 16), 16)
    cap_vmem = max(((8 << 20) // max(seq_len * V * 4, 1)) // 16 * 16, 16)
    tm = max(16, min(tm, cap_megacore, cap_vmem))
    num_m = pl.cdiv(M, tm)
    M_pad = num_m * tm

    # glue: per-row source indices into features.reshape(N*B, H); padded rows
    # point at the out-of-range index NB so their hidden0 is exactly zero.
    rows = jnp.arange(M_pad, dtype=jnp.int32)
    i_idx = rows // NB
    j_idx = (rows // B) % N
    b_idx = rows % B
    valid = rows < M
    src_i = jnp.where(valid, i_idx * B + b_idx, NB).astype(jnp.int32).reshape(M_pad, 1)
    src_j = jnp.where(valid, j_idx * B + b_idx, NB).astype(jnp.int32).reshape(M_pad, 1)
    feats_flat = jnp.zeros((NB, Hp), jnp.float32).at[:, :H].set(
        features.reshape(NB, H).astype(jnp.float32))

    kernel = functools.partial(_edges_gen_kernel, bos_token)

    def const_spec(shape):
        return pl.BlockSpec(shape, lambda m: (0, 0))

    out_flat = pl.pallas_call(
        kernel,
        out_shape=jax.ShapeDtypeStruct((seq_len, M_pad, V), jnp.float32),
        grid_spec=pltpu.PrefetchScalarGridSpec(
            num_scalar_prefetch=0,
            grid=(num_m,),
            in_specs=[
                pl.BlockSpec((tm, 1), lambda m: (m, 0)),   # src_i
                pl.BlockSpec((tm, 1), lambda m: (m, 0)),   # src_j
                const_spec((NB, Hp)),                      # features (flat, H-padded)
                const_spec((V + Hp, 4 * Hp)),              # fused gate matrix (bf16)
                const_spec((1, Hp)),                       # b_hn    (f32)
                const_spec((Hp, V)),                       # W_out^T (bf16, H-padded)
                const_spec((1, V)),                        # b_out   (f32)
            ],
            out_specs=pl.BlockSpec((seq_len, tm, V), lambda m: (0, m, 0)),
        ),
        compiler_params=pltpu.CompilerParams(
            dimension_semantics=("parallel",)),
    )(src_i, src_j, feats_flat,
      params["wbig"], params["bhh_n"], params["wout_t"], params["bout"])

    # glue: (seq_len, M_pad, V) -> (N, N, B, seq_len, V)
    out = out_flat[:, :M, :].reshape(seq_len, N, N, B, V)
    return out.transpose(1, 2, 3, 0, 4)


def init_params(key, hidden_dim, vocab_size):
    """Raw PyTorch-style parameters (nn.GRU / nn.Linear / nn.Embedding init)."""
    H, V = hidden_dim, vocab_size
    ks = jax.random.split(key, 7)
    k = 1.0 / jnp.sqrt(jnp.float32(H))
    return {
        "w_ih": jax.random.uniform(ks[0], (3 * H, H), jnp.float32, -k, k),
        "w_hh": jax.random.uniform(ks[1], (3 * H, H), jnp.float32, -k, k),
        "b_ih": jax.random.uniform(ks[2], (3 * H,), jnp.float32, -k, k),
        "b_hh": jax.random.uniform(ks[3], (3 * H,), jnp.float32, -k, k),
        "w_out": jax.random.uniform(ks[4], (V, H), jnp.float32, -k, k),
        "b_out": jax.random.uniform(ks[5], (V,), jnp.float32, -k, k),
        "emb": jax.random.normal(ks[6], (V, H), jnp.float32),
    }


def fuse_params(p):
    """Fold embedding+ReLU+W_ih+biases into per-gate tables (exact for one-hot
    inputs) and pack everything into one H-padded (V+Hp, 4*Hp) gate matrix."""
    H = p["w_hh"].shape[1]
    V = p["w_out"].shape[0]
    Hp = _round_up(H, 128)

    emb_relu = jnp.maximum(p["emb"], 0.0)                       # (V, H)
    gx_tab = emb_relu @ p["w_ih"].T + p["b_ih"][None, :]        # (V, 3H)
    whh_t = p["w_hh"].T                                         # (H, 3H)
    b_hh = p["b_hh"]

    def pad_cols(a):       # (V, H) -> (V, Hp)
        return jnp.pad(a, ((0, 0), (0, Hp - H)))

    def pad_sq(a):         # (H, H) -> (Hp, Hp)
        return jnp.pad(a, ((0, Hp - H), (0, Hp - H)))

    table_r = pad_cols(gx_tab[:, 0:H] + b_hh[0:H][None, :])
    table_z = pad_cols(gx_tab[:, H:2 * H] + b_hh[H:2 * H][None, :])
    table_n = pad_cols(gx_tab[:, 2 * H:3 * H])
    whh_r = pad_sq(whh_t[:, 0:H])
    whh_z = pad_sq(whh_t[:, H:2 * H])
    whh_n = pad_sq(whh_t[:, 2 * H:3 * H])

    top = jnp.concatenate(
        [table_r, table_z, table_n, jnp.zeros((V, Hp), jnp.float32)], axis=1)
    bot = jnp.concatenate(
        [whh_r, whh_z, jnp.zeros((Hp, Hp), jnp.float32), whh_n], axis=1)
    wbig = jnp.concatenate([top, bot], axis=0).astype(jnp.bfloat16)  # (V+Hp, 4Hp)

    bhh_n = jnp.zeros((1, Hp), jnp.float32).at[0, :H].set(b_hh[2 * H:3 * H])
    wout_t = (jnp.zeros((Hp, V), jnp.float32)
              .at[:H, :].set(p["w_out"].T)).astype(jnp.bfloat16)
    bout = p["b_out"].reshape(1, V).astype(jnp.float32)
    return {"wbig": wbig, "bhh_n": bhh_n, "wout_t": wout_t, "bout": bout}


def _ref_decode(hidden0_pad, params, seq_len, bos_token):
    """Pure-JAX reference mirroring the kernel math (bf16 dots, f32 accum)."""
    M, Hp = hidden0_pad.shape
    V = params["bout"].shape[-1]
    col = jnp.arange(V, dtype=jnp.int32)[None, :]
    h = hidden0_pad.astype(jnp.float32)
    tok = jnp.full((M, 1), bos_token, jnp.int32)
    outs = [jnp.broadcast_to((col == bos_token).astype(jnp.float32), (M, V))]
    for _ in range(1, seq_len):
        onehot = (col == tok).astype(jnp.bfloat16)
        x = jnp.concatenate([onehot, h.astype(jnp.bfloat16)], axis=-1)
        g = jnp.dot(x, params["wbig"], preferred_element_type=jnp.float32)
        r = jax.nn.sigmoid(g[:, 0:Hp])
        z = jax.nn.sigmoid(g[:, Hp:2 * Hp])
        n = jnp.tanh(g[:, 2 * Hp:3 * Hp] + r * (g[:, 3 * Hp:4 * Hp] + params["bhh_n"]))
        h = (1.0 - z) * n + z * h
        logits = (jnp.dot(h.astype(jnp.bfloat16), params["wout_t"],
                          preferred_element_type=jnp.float32) + params["bout"])
        outs.append(logits)
        tok = jnp.argmax(logits, axis=-1).astype(jnp.int32)[:, None]
    return jnp.stack(outs)


if __name__ == "__main__":
    N, B, H, V = 4, 2, 32, 128      # num_nodes, batch, hidden_dim, vocab_size
    seq_len = 6
    bos_token = 1

    key = jax.random.PRNGKey(0)
    k_feat, k_param = jax.random.split(key)
    features = jax.random.normal(k_feat, (N, B, H), jnp.float32)
    params = fuse_params(init_params(k_param, H, V))
    Hp = params["wout_t"].shape[0]

    # default tm=128 is capped to 16 here (M=32) so the parallel m axis has 2 tiles.
    out = edges_gen_forward(features, seq_len, params, bos_token)
    out = jax.block_until_ready(out)

    assert out.shape == (N, N, B, seq_len, V), out.shape
    assert bool(jnp.all(jnp.isfinite(out)))

    M = N * N * B
    flat = out.transpose(3, 0, 1, 2, 4).reshape(seq_len, M, V)

    # t = 0 slab: exactly 1.0 at the bos column, 0 elsewhere.
    expected0 = (jnp.arange(V)[None, :] == bos_token).astype(jnp.float32)
    assert bool(jnp.allclose(flat[0], jnp.broadcast_to(expected0, (M, V))))

    # full greedy rollout vs a pure-JAX reference of the same computation
    hidden0 = (features[:, None] - features[None, :]).reshape(M, H)
    hidden0_pad = jnp.zeros((M, Hp), jnp.float32).at[:, :H].set(hidden0)
    ref = _ref_decode(hidden0_pad, params, seq_len, bos_token)
    err = float(jnp.max(jnp.abs(flat - ref)))
    assert bool(jnp.allclose(flat, ref, rtol=1e-2, atol=1e-2)), err

    print("KERNEL_OK")
</pallas_src>

<mosaic_0001>
module attributes {stable_mosaic.version = 11 : i64} {
  func.func @_edges_gen_kernel(%arg0: i32, %arg1: memref<16x1xi32, #tpu.memory_space<vmem>>, %arg2: memref<16x1xi32, #tpu.memory_space<vmem>>, %arg3: memref<8x128xf32, #tpu.memory_space<vmem>>, %arg4: memref<256x512xbf16, #tpu.memory_space<vmem>>, %arg5: memref<1x128xf32, #tpu.memory_space<vmem>>, %arg6: memref<128x128xbf16, #tpu.memory_space<vmem>>, %arg7: memref<1x128xf32, #tpu.memory_space<vmem>>, %arg8: memref<6x16x128xf32, #tpu.memory_space<vmem>>) attributes {dimension_semantics = [#tpu.dimension_semantics<parallel>], iteration_bounds = array<i64: 2>, scalar_prefetch = 0 : i64, scratch_operands = 0 : i64, tpu.core_type = #tpu.core_type<tc>, window_params = [{transform_indices = @transform_0, window_bounds = array<i64: 16, 1>}, {transform_indices = @transform_1, window_bounds = array<i64: 16, 1>}, {pipeline_mode = #tpu.pipeline_mode<synchronous>, transform_indices = @transform_2, window_bounds = array<i64: 8, 128>}, {pipeline_mode = #tpu.pipeline_mode<synchronous>, transform_indices = @transform_3, window_bounds = array<i64: 256, 512>}, {pipeline_mode = #tpu.pipeline_mode<synchronous>, transform_indices = @transform_4, window_bounds = array<i64: 1, 128>}, {pipeline_mode = #tpu.pipeline_mode<synchronous>, transform_indices = @transform_5, window_bounds = array<i64: 128, 128>}, {pipeline_mode = #tpu.pipeline_mode<synchronous>, transform_indices = @transform_6, window_bounds = array<i64: 1, 128>}, {transform_indices = @transform_7, window_bounds = array<i64: 6, 16, 128>}]} {
    %0 = tpu.iota {dimensions = array<i32: 1>} : vector<16x128xi32>
    %1 = tpu.iota {dimensions = array<i32: 1>} : vector<16x8xi32>
    %c0 = arith.constant 0 : index
    %c0_0 = arith.constant 0 : index
    %2 = vector.load %arg1[%c0, %c0_0] : memref<16x1xi32, #tpu.memory_space<vmem>>, vector<16x1xi32>
    %3 = vector.broadcast %2 : vector<16x1xi32> to vector<16x8xi32>
    %4 = arith.cmpi eq, %1, %3 : vector<16x8xi32>
    %5 = arith.extui %4 : vector<16x8xi1> to vector<16x8xi32>
    %6 = arith.sitofp %5 : vector<16x8xi32> to vector<16x8xf32>
    %c0_1 = arith.constant 0 : index
    %c0_2 = arith.constant 0 : index
    %7 = vector.load %arg2[%c0_1, %c0_2] : memref<16x1xi32, #tpu.memory_space<vmem>>, vector<16x1xi32>
    %8 = vector.broadcast %7 : vector<16x1xi32> to vector<16x8xi32>
    %9 = arith.cmpi eq, %1, %8 : vector<16x8xi32>
    %10 = arith.extui %9 : vector<16x8xi1> to vector<16x8xi32>
    %11 = arith.sitofp %10 : vector<16x8xi32> to vector<16x8xf32>
    %12 = arith.subf %6, %11 : vector<16x8xf32>
    %c0_3 = arith.constant 0 : index
    %c0_4 = arith.constant 0 : index
    %13 = vector.load %arg3[%c0_3, %c0_4] : memref<8x128xf32, #tpu.memory_space<vmem>>, vector<8x128xf32>
    %cst = arith.constant dense<0.000000e+00> : vector<16x128xf32>
    %14 = tpu.matmul %12, %13, %cst {dimension_numbers = #tpu.dot_dimension_numbers<[1], [0], [0], [1], [0, 0, 1, 1], [], []>} : vector<16x8xf32>, vector<8x128xf32>, vector<16x128xf32> -> vector<16x128xf32>
    %c1_i32 = arith.constant 1 : i32
    %15 = vector.broadcast %c1_i32 : i32 to vector<16x128xi32>
    %16 = arith.cmpi eq, %0, %15 : vector<16x128xi32>
    %17 = arith.extui %16 : vector<16x128xi1> to vector<16x128xi32>
    %18 = arith.sitofp %17 : vector<16x128xi32> to vector<16x128xf32>
    %c0_5 = arith.constant 0 : index
    %c0_6 = arith.constant 0 : index
    %c0_7 = arith.constant 0 : index
    %19 = vector.load %arg8[%c0_5, %c0_6, %c0_7] : memref<6x16x128xf32, #tpu.memory_space<vmem>>, vector<1x16x128xf32>
    %20 = vector.shape_cast %19 : vector<1x16x128xf32> to vector<16x128xf32>
    %21 = vector.shape_cast %18 : vector<16x128xf32> to vector<1x16x128xf32>
    tpu.vector_store %arg8[%c0_5, %c0_6, %c0_7], %21 {strides = array<i32>} : memref<6x16x128xf32, #tpu.memory_space<vmem>>, vector<1x16x128xf32>,
    %c1_i32_8 = arith.constant 1 : i32
    %22 = vector.broadcast %c1_i32_8 : i32 to vector<16x1xi32>
    %c1_i32_9 = arith.constant 1 : i32
    %23 = vector.broadcast %22 : vector<16x1xi32> to vector<16x128xi32>
    %24 = arith.cmpi eq, %0, %23 : vector<16x128xi32>
    %25 = arith.extui %24 : vector<16x128xi1> to vector<16x128xi32>
    %26 = arith.sitofp %25 : vector<16x128xi32> to vector<16x128xf32>
    %27 = arith.truncf %26 : vector<16x128xf32> to vector<16x128xbf16>
    %28 = arith.truncf %14 : vector<16x128xf32> to vector<16x128xbf16>
    %29 = tpu.concatenate %27, %28 in 1 : vector<16x128xbf16>, vector<16x128xbf16> -> vector<16x256xbf16>
    %c0_10 = arith.constant 0 : index
    %c0_11 = arith.constant 0 : index
    %30 = vector.load %arg4[%c0_10, %c0_11] : memref<256x512xbf16, #tpu.memory_space<vmem>>, vector<256x512xbf16>
    %cst_12 = arith.constant dense<0.000000e+00> : vector<16x512xf32>
    %31 = tpu.matmul %29, %30, %cst_12 {dimension_numbers = #tpu.dot_dimension_numbers<[1], [0], [0], [1], [0, 0, 1, 1], [], []>} : vector<16x256xbf16>, vector<256x512xbf16>, vector<16x512xf32> -> vector<16x512xf32>
    %32 = vector.extract_strided_slice %31 {offsets = [0, 0], sizes = [16, 128], strides = [1, 1]} : vector<16x512xf32> to vector<16x128xf32>
    %33 = arith.negf %32 : vector<16x128xf32>
    %34 = math.exp %33 : vector<16x128xf32>
    %cst_13 = arith.constant 1.000000e+00 : f32
    %35 = vector.broadcast %cst_13 : f32 to vector<16x128xf32>
    %36 = arith.addf %35, %34 : vector<16x128xf32>
    %37 = arith.divf %35, %36 : vector<16x128xf32>
    %38 = vector.extract_strided_slice %31 {offsets = [0, 128], sizes = [16, 128], strides = [1, 1]} : vector<16x512xf32> to vector<16x128xf32>
    %39 = arith.negf %38 : vector<16x128xf32>
    %40 = math.exp %39 : vector<16x128xf32>
    %cst_14 = arith.constant 1.000000e+00 : f32
    %41 = vector.broadcast %cst_14 : f32 to vector<16x128xf32>
    %42 = arith.addf %41, %40 : vector<16x128xf32>
    %43 = arith.divf %41, %42 : vector<16x128xf32>
    %44 = vector.extract_strided_slice %31 {offsets = [0, 384], sizes = [16, 128], strides = [1, 1]} : vector<16x512xf32> to vector<16x128xf32>
    %c0_15 = arith.constant 0 : index
    %c0_16 = arith.constant 0 : index
    %45 = vector.load %arg5[%c0_15, %c0_16] : memref<1x128xf32, #tpu.memory_space<vmem>>, vector<1x128xf32>
    %46 = vector.broadcast %45 : vector<1x128xf32> to vector<16x128xf32>
    %47 = arith.addf %44, %46 : vector<16x128xf32>
    %48 = vector.extract_strided_slice %31 {offsets = [0, 256], sizes = [16, 128], strides = [1, 1]} : vector<16x512xf32> to vector<16x128xf32>
    %49 = arith.mulf %37, %47 : vector<16x128xf32>
    %50 = arith.addf %48, %49 : vector<16x128xf32>
    %51 = math.tanh %50 : vector<16x128xf32>
    %cst_17 = arith.constant 1.000000e+00 : f32
    %52 = vector.broadcast %cst_17 : f32 to vector<16x128xf32>
    %53 = arith.subf %52, %43 : vector<16x128xf32>
    %54 = arith.mulf %53, %51 : vector<16x128xf32>
    %55 = arith.mulf %43, %14 : vector<16x128xf32>
    %56 = arith.addf %54, %55 : vector<16x128xf32>
    %57 = arith.truncf %56 : vector<16x128xf32> to vector<16x128xbf16>
    %c0_18 = arith.constant 0 : index
    %c0_19 = arith.constant 0 : index
    %58 = vector.load %arg6[%c0_18, %c0_19] : memref<128x128xbf16, #tpu.memory_space<vmem>>, vector<128x128xbf16>
    %cst_20 = arith.constant dense<0.000000e+00> : vector<16x128xf32>
    %59 = tpu.matmul %57, %58, %cst_20 {dimension_numbers = #tpu.dot_dimension_numbers<[1], [0], [0], [1], [0, 0, 1, 1], [], []>} : vector<16x128xbf16>, vector<128x128xbf16>, vector<16x128xf32> -> vector<16x128xf32>
    %c0_21 = arith.constant 0 : index
    %c0_22 = arith.constant 0 : index
    %60 = vector.load %arg7[%c0_21, %c0_22] : memref<1x128xf32, #tpu.memory_space<vmem>>, vector<1x128xf32>
    %61 = vector.broadcast %60 : vector<1x128xf32> to vector<16x128xf32>
    %62 = arith.addf %59, %61 : vector<16x128xf32>
    %63 = arith.index_cast %c1_i32_9 : i32 to index
    %c0_23 = arith.constant 0 : index
    %c0_24 = arith.constant 0 : index
    %64 = vector.load %arg8[%63, %c0_23, %c0_24] : memref<6x16x128xf32, #tpu.memory_space<vmem>>, vector<1x16x128xf32>
    %65 = vector.shape_cast %64 : vector<1x16x128xf32> to vector<16x128xf32>
    %66 = vector.shape_cast %62 : vector<16x128xf32> to vector<1x16x128xf32>
    tpu.vector_store %arg8[%63, %c0_23, %c0_24], %66 {strides = array<i32>} : memref<6x16x128xf32, #tpu.memory_space<vmem>>, vector<1x16x128xf32>,
    %cst_25 = arith.constant dense<0xFF800000> : vector<16xf32>
    %67 = vector.multi_reduction <maximumf>, %62, %cst_25 [1] : vector<16x128xf32> to vector<16xf32>
    %68 = vector.shape_cast %67 : vector<16xf32> to vector<16x1xf32>
    %69 = vector.broadcast %68 : vector<16x1xf32> to vector<16x128xf32>
    %70 = arith.cmpf oge, %62, %69 : vector<16x128xf32>
    %c128_i32 = arith.constant 128 : i32
    %71 = vector.broadcast %c128_i32 : i32 to vector<16x128xi32>
    %72 = arith.select %70, %0, %71 : vector<16x128xi1>, vector<16x128xi32>
    %cst_26 = arith.constant dense<2147483647> : vector<16xi32>
    %73 = vector.multi_reduction <minsi>, %72, %cst_26 [1] : vector<16x128xi32> to vector<16xi32>
    %74 = vector.shape_cast %73 : vector<16xi32> to vector<16x1xi32>
    %c2_i32 = arith.constant 2 : i32
    %75 = vector.broadcast %74 : vector<16x1xi32> to vector<16x128xi32>
    %76 = arith.cmpi eq, %0, %75 : vector<16x128xi32>
    %77 = arith.extui %76 : vector<16x128xi1> to vector<16x128xi32>
    %78 = arith.sitofp %77 : vector<16x128xi32> to vector<16x128xf32>
    %79 = arith.truncf %78 : vector<16x128xf32> to vector<16x128xbf16>
    %80 = arith.truncf %56 : vector<16x128xf32> to vector<16x128xbf16>
    %81 = tpu.concatenate %79, %80 in 1 : vector<16x128xbf16>, vector<16x128xbf16> -> vector<16x256xbf16>
    %c0_27 = arith.constant 0 : index
    %c0_28 = arith.constant 0 : index
    %82 = vector.load %arg4[%c0_27, %c0_28] : memref<256x512xbf16, #tpu.memory_space<vmem>>, vector<256x512xbf16>
    %cst_29 = arith.constant dense<0.000000e+00> : vector<16x512xf32>
    %83 = tpu.matmul %81, %82, %cst_29 {dimension_numbers = #tpu.dot_dimension_numbers<[1], [0], [0], [1], [0, 0, 1, 1], [], []>} : vector<16x256xbf16>, vector<256x512xbf16>, vector<16x512xf32> -> vector<16x512xf32>
    %84 = vector.extract_strided_slice %83 {offsets = [0, 0], sizes = [16, 128], strides = [1, 1]} : vector<16x512xf32> to vector<16x128xf32>
    %85 = arith.negf %84 : vector<16x128xf32>
    %86 = math.exp %85 : vector<16x128xf32>
    %cst_30 = arith.constant 1.000000e+00 : f32
    %87 = vector.broadcast %cst_30 : f32 to vector<16x128xf32>
    %88 = arith.addf %87, %86 : vector<16x128xf32>
    %89 = arith.divf %87, %88 : vector<16x128xf32>
    %90 = vector.extract_strided_slice %83 {offsets = [0, 128], sizes = [16, 128], strides = [1, 1]} : vector<16x512xf32> to vector<16x128xf32>
    %91 = arith.negf %90 : vector<16x128xf32>
    %92 = math.exp %91 : vector<16x128xf32>
    %cst_31 = arith.constant 1.000000e+00 : f32
    %93 = vector.broadcast %cst_31 : f32 to vector<16x128xf32>
    %94 = arith.addf %93, %92 : vector<16x128xf32>
    %95 = arith.divf %93, %94 : vector<16x128xf32>
    %96 = vector.extract_strided_slice %83 {offsets = [0, 384], sizes = [16, 128], strides = [1, 1]} : vector<16x512xf32> to vector<16x128xf32>
    %c0_32 = arith.constant 0 : index
    %c0_33 = arith.constant 0 : index
    %97 = vector.load %arg5[%c0_32, %c0_33] : memref<1x128xf32, #tpu.memory_space<vmem>>, vector<1x128xf32>
    %98 = vector.broadcast %97 : vector<1x128xf32> to vector<16x128xf32>
    %99 = arith.addf %96, %98 : vector<16x128xf32>
    %100 = vector.extract_strided_slice %83 {offsets = [0, 256], sizes = [16, 128], strides = [1, 1]} : vector<16x512xf32> to vector<16x128xf32>
    %101 = arith.mulf %89, %99 : vector<16x128xf32>
    %102 = arith.addf %100, %101 : vector<16x128xf32>
    %103 = math.tanh %102 : vector<16x128xf32>
    %cst_34 = arith.constant 1.000000e+00 : f32
    %104 = vector.broadcast %cst_34 : f32 to vector<16x128xf32>
    %105 = arith.subf %104, %95 : vector<16x128xf32>
    %106 = arith.mulf %105, %103 : vector<16x128xf32>
    %107 = arith.mulf %95, %56 : vector<16x128xf32>
    %108 = arith.addf %106, %107 : vector<16x128xf32>
    %109 = arith.truncf %108 : vector<16x128xf32> to vector<16x128xbf16>
    %c0_35 = arith.constant 0 : index
    %c0_36 = arith.constant 0 : index
    %110 = vector.load %arg6[%c0_35, %c0_36] : memref<128x128xbf16, #tpu.memory_space<vmem>>, vector<128x128xbf16>
    %cst_37 = arith.constant dense<0.000000e+00> : vector<16x128xf32>
    %111 = tpu.matmul %109, %110, %cst_37 {dimension_numbers = #tpu.dot_dimension_numbers<[1], [0], [0], [1], [0, 0, 1, 1], [], []>} : vector<16x128xbf16>, vector<128x128xbf16>, vector<16x128xf32> -> vector<16x128xf32>
    %c0_38 = arith.constant 0 : index
    %c0_39 = arith.constant 0 : index
    %112 = vector.load %arg7[%c0_38, %c0_39] : memref<1x128xf32, #tpu.memory_space<vmem>>, vector<1x128xf32>
    %113 = vector.broadcast %112 : vector<1x128xf32> to vector<16x128xf32>
    %114 = arith.addf %111, %113 : vector<16x128xf32>
    %115 = arith.index_cast %c2_i32 : i32 to index
    %c0_40 = arith.constant 0 : index
    %c0_41 = arith.constant 0 : index
    %116 = vector.load %arg8[%115, %c0_40, %c0_41] : memref<6x16x128xf32, #tpu.memory_space<vmem>>, vector<1x16x128xf32>
    %117 = vector.shape_cast %116 : vector<1x16x128xf32> to vector<16x128xf32>
    %118 = vector.shape_cast %114 : vector<16x128xf32> to vector<1x16x128xf32>
    tpu.vector_store %arg8[%115, %c0_40, %c0_41], %118 {strides = array<i32>} : memref<6x16x128xf32, #tpu.memory_space<vmem>>, vector<1x16x128xf32>,
    %cst_42 = arith.constant dense<0xFF800000> : vector<16xf32>
    %119 = vector.multi_reduction <maximumf>, %114, %cst_42 [1] : vector<16x128xf32> to vector<16xf32>
    %120 = vector.shape_cast %119 : vector<16xf32> to vector<16x1xf32>
    %121 = vector.broadcast %120 : vector<16x1xf32> to vector<16x128xf32>
    %122 = arith.cmpf oge, %114, %121 : vector<16x128xf32>
    %c128_i32_43 = arith.constant 128 : i32
    %123 = vector.broadcast %c128_i32_43 : i32 to vector<16x128xi32>
    %124 = arith.select %122, %0, %123 : vector<16x128xi1>, vector<16x128xi32>
    %cst_44 = arith.constant dense<2147483647> : vector<16xi32>
    %125 = vector.multi_reduction <minsi>, %124, %cst_44 [1] : vector<16x128xi32> to vector<16xi32>
    %126 = vector.shape_cast %125 : vector<16xi32> to vector<16x1xi32>
    %c3_i32 = arith.constant 3 : i32
    %127 = vector.broadcast %126 : vector<16x1xi32> to vector<16x128xi32>
    %128 = arith.cmpi eq, %0, %127 : vector<16x128xi32>
    %129 = arith.extui %128 : vector<16x128xi1> to vector<16x128xi32>
    %130 = arith.sitofp %129 : vector<16x128xi32> to vector<16x128xf32>
    %131 = arith.truncf %130 : vector<16x128xf32> to vector<16x128xbf16>
    %132 = arith.truncf %108 : vector<16x128xf32> to vector<16x128xbf16>
    %133 = tpu.concatenate %131, %132 in 1 : vector<16x128xbf16>, vector<16x128xbf16> -> vector<16x256xbf16>
    %c0_45 = arith.constant 0 : index
    %c0_46 = arith.constant 0 : index
    %134 = vector.load %arg4[%c0_45, %c0_46] : memref<256x512xbf16, #tpu.memory_space<vmem>>, vector<256x512xbf16>
    %cst_47 = arith.constant dense<0.000000e+00> : vector<16x512xf32>
    %135 = tpu.matmul %133, %134, %cst_47 {dimension_numbers = #tpu.dot_dimension_numbers<[1], [0], [0], [1], [0, 0, 1, 1], [], []>} : vector<16x256xbf16>, vector<256x512xbf16>, vector<16x512xf32> -> vector<16x512xf32>
    %136 = vector.extract_strided_slice %135 {offsets = [0, 0], sizes = [16, 128], strides = [1, 1]} : vector<16x512xf32> to vector<16x128xf32>
    %137 = arith.negf %136 : vector<16x128xf32>
    %138 = math.exp %137 : vector<16x128xf32>
    %cst_48 = arith.constant 1.000000e+00 : f32
    %139 = vector.broadcast %cst_48 : f32 to vector<16x128xf32>
    %140 = arith.addf %139, %138 : vector<16x128xf32>
    %141 = arith.divf %139, %140 : vector<16x128xf32>
    %142 = vector.extract_strided_slice %135 {offsets = [0, 128], sizes = [16, 128], strides = [1, 1]} : vector<16x512xf32> to vector<16x128xf32>
    %143 = arith.negf %142 : vector<16x128xf32>
    %144 = math.exp %143 : vector<16x128xf32>
    %cst_49 = arith.constant 1.000000e+00 : f32
    %145 = vector.broadcast %cst_49 : f32 to vector<16x128xf32>
    %146 = arith.addf %145, %144 : vector<16x128xf32>
    %147 = arith.divf %145, %146 : vector<16x128xf32>
    %148 = vector.extract_strided_slice %135 {offsets = [0, 384], sizes = [16, 128], strides = [1, 1]} : vector<16x512xf32> to vector<16x128xf32>
    %c0_50 = arith.constant 0 : index
    %c0_51 = arith.constant 0 : index
    %149 = vector.load %arg5[%c0_50, %c0_51] : memref<1x128xf32, #tpu.memory_space<vmem>>, vector<1x128xf32>
    %150 = vector.broadcast %149 : vector<1x128xf32> to vector<16x128xf32>
    %151 = arith.addf %148, %150 : vector<16x128xf32>
    %152 = vector.extract_strided_slice %135 {offsets = [0, 256], sizes = [16, 128], strides = [1, 1]} : vector<16x512xf32> to vector<16x128xf32>
    %153 = arith.mulf %141, %151 : vector<16x128xf32>
    %154 = arith.addf %152, %153 : vector<16x128xf32>
    %155 = math.tanh %154 : vector<16x128xf32>
    %cst_52 = arith.constant 1.000000e+00 : f32
    %156 = vector.broadcast %cst_52 : f32 to vector<16x128xf32>
    %157 = arith.subf %156, %147 : vector<16x128xf32>
    %158 = arith.mulf %157, %155 : vector<16x128xf32>
    %159 = arith.mulf %147, %108 : vector<16x128xf32>
    %160 = arith.addf %158, %159 : vector<16x128xf32>
    %161 = arith.truncf %160 : vector<16x128xf32> to vector<16x128xbf16>
    %c0_53 = arith.constant 0 : index
    %c0_54 = arith.constant 0 : index
    %162 = vector.load %arg6[%c0_53, %c0_54] : memref<128x128xbf16, #tpu.memory_space<vmem>>, vector<128x128xbf16>
    %cst_55 = arith.constant dense<0.000000e+00> : vector<16x128xf32>
    %163 = tpu.matmul %161, %162, %cst_55 {dimension_numbers = #tpu.dot_dimension_numbers<[1], [0], [0], [1], [0, 0, 1, 1], [], []>} : vector<16x128xbf16>, vector<128x128xbf16>, vector<16x128xf32> -> vector<16x128xf32>
    %c0_56 = arith.constant 0 : index
    %c0_57 = arith.constant 0 : index
    %164 = vector.load %arg7[%c0_56, %c0_57] : memref<1x128xf32, #tpu.memory_space<vmem>>, vector<1x128xf32>
    %165 = vector.broadcast %164 : vector<1x128xf32> to vector<16x128xf32>
    %166 = arith.addf %163, %165 : vector<16x128xf32>
    %167 = arith.index_cast %c3_i32 : i32 to index
    %c0_58 = arith.constant 0 : index
    %c0_59 = arith.constant 0 : index
    %168 = vector.load %arg8[%167, %c0_58, %c0_59] : memref<6x16x128xf32, #tpu.memory_space<vmem>>, vector<1x16x128xf32>
    %169 = vector.shape_cast %168 : vector<1x16x128xf32> to vector<16x128xf32>
    %170 = vector.shape_cast %166 : vector<16x128xf32> to vector<1x16x128xf32>
    tpu.vector_store %arg8[%167, %c0_58, %c0_59], %170 {strides = array<i32>} : memref<6x16x128xf32, #tpu.memory_space<vmem>>, vector<1x16x128xf32>,
    %cst_60 = arith.constant dense<0xFF800000> : vector<16xf32>
    %171 = vector.multi_reduction <maximumf>, %166, %cst_60 [1] : vector<16x128xf32> to vector<16xf32>
    %172 = vector.shape_cast %171 : vector<16xf32> to vector<16x1xf32>
    %173 = vector.broadcast %172 : vector<16x1xf32> to vector<16x128xf32>
    %174 = arith.cmpf oge, %166, %173 : vector<16x128xf32>
    %c128_i32_61 = arith.constant 128 : i32
    %175 = vector.broadcast %c128_i32_61 : i32 to vector<16x128xi32>
    %176 = arith.select %174, %0, %175 : vector<16x128xi1>, vector<16x128xi32>
    %cst_62 = arith.constant dense<2147483647> : vector<16xi32>
    %177 = vector.multi_reduction <minsi>, %176, %cst_62 [1] : vector<16x128xi32> to vector<16xi32>
    %178 = vector.shape_cast %177 : vector<16xi32> to vector<16x1xi32>
    %c4_i32 = arith.constant 4 : i32
    %179 = vector.broadcast %178 : vector<16x1xi32> to vector<16x128xi32>
    %180 = arith.cmpi eq, %0, %179 : vector<16x128xi32>
    %181 = arith.extui %180 : vector<16x128xi1> to vector<16x128xi32>
    %182 = arith.sitofp %181 : vector<16x128xi32> to vector<16x128xf32>
    %183 = arith.truncf %182 : vector<16x128xf32> to vector<16x128xbf16>
    %184 = arith.truncf %160 : vector<16x128xf32> to vector<16x128xbf16>
    %185 = tpu.concatenate %183, %184 in 1 : vector<16x128xbf16>, vector<16x128xbf16> -> vector<16x256xbf16>
    %c0_63 = arith.constant 0 : index
    %c0_64 = arith.constant 0 : index
    %186 = vector.load %arg4[%c0_63, %c0_64] : memref<256x512xbf16, #tpu.memory_space<vmem>>, vector<256x512xbf16>
    %cst_65 = arith.constant dense<0.000000e+00> : vector<16x512xf32>
    %187 = tpu.matmul %185, %186, %cst_65 {dimension_numbers = #tpu.dot_dimension_numbers<[1], [0], [0], [1], [0, 0, 1, 1], [], []>} : vector<16x256xbf16>, vector<256x512xbf16>, vector<16x512xf32> -> vector<16x512xf32>
    %188 = vector.extract_strided_slice %187 {offsets = [0, 0], sizes = [16, 128], strides = [1, 1]} : vector<16x512xf32> to vector<16x128xf32>
    %189 = arith.negf %188 : vector<16x128xf32>
    %190 = math.exp %189 : vector<16x128xf32>
    %cst_66 = arith.constant 1.000000e+00 : f32
    %191 = vector.broadcast %cst_66 : f32 to vector<16x128xf32>
    %192 = arith.addf %191, %190 : vector<16x128xf32>
    %193 = arith.divf %191, %192 : vector<16x128xf32>
    %194 = vector.extract_strided_slice %187 {offsets = [0, 128], sizes = [16, 128], strides = [1, 1]} : vector<16x512xf32> to vector<16x128xf32>
    %195 = arith.negf %194 : vector<16x128xf32>
    %196 = math.exp %195 : vector<16x128xf32>
    %cst_67 = arith.constant 1.000000e+00 : f32
    %197 = vector.broadcast %cst_67 : f32 to vector<16x128xf32>
    %198 = arith.addf %197, %196 : vector<16x128xf32>
    %199 = arith.divf %197, %198 : vector<16x128xf32>
    %200 = vector.extract_strided_slice %187 {offsets = [0, 384], sizes = [16, 128], strides = [1, 1]} : vector<16x512xf32> to vector<16x128xf32>
    %c0_68 = arith.constant 0 : index
    %c0_69 = arith.constant 0 : index
    %201 = vector.load %arg5[%c0_68, %c0_69] : memref<1x128xf32, #tpu.memory_space<vmem>>, vector<1x128xf32>
    %202 = vector.broadcast %201 : vector<1x128xf32> to vector<16x128xf32>
    %203 = arith.addf %200, %202 : vector<16x128xf32>
    %204 = vector.extract_strided_slice %187 {offsets = [0, 256], sizes = [16, 128], strides = [1, 1]} : vector<16x512xf32> to vector<16x128xf32>
    %205 = arith.mulf %193, %203 : vector<16x128xf32>
    %206 = arith.addf %204, %205 : vector<16x128xf32>
    %207 = math.tanh %206 : vector<16x128xf32>
    %cst_70 = arith.constant 1.000000e+00 : f32
    %208 = vector.broadcast %cst_70 : f32 to vector<16x128xf32>
    %209 = arith.subf %208, %199 : vector<16x128xf32>
    %210 = arith.mulf %209, %207 : vector<16x128xf32>
    %211 = arith.mulf %199, %160 : vector<16x128xf32>
    %212 = arith.addf %210, %211 : vector<16x128xf32>
    %213 = arith.truncf %212 : vector<16x128xf32> to vector<16x128xbf16>
    %c0_71 = arith.constant 0 : index
    %c0_72 = arith.constant 0 : index
    %214 = vector.load %arg6[%c0_71, %c0_72] : memref<128x128xbf16, #tpu.memory_space<vmem>>, vector<128x128xbf16>
    %cst_73 = arith.constant dense<0.000000e+00> : vector<16x128xf32>
    %215 = tpu.matmul %213, %214, %cst_73 {dimension_numbers = #tpu.dot_dimension_numbers<[1], [0], [0], [1], [0, 0, 1, 1], [], []>} : vector<16x128xbf16>, vector<128x128xbf16>, vector<16x128xf32> -> vector<16x128xf32>
    %c0_74 = arith.constant 0 : index
    %c0_75 = arith.constant 0 : index
    %216 = vector.load %arg7[%c0_74, %c0_75] : memref<1x128xf32, #tpu.memory_space<vmem>>, vector<1x128xf32>
    %217 = vector.broadcast %216 : vector<1x128xf32> to vector<16x128xf32>
    %218 = arith.addf %215, %217 : vector<16x128xf32>
    %219 = arith.index_cast %c4_i32 : i32 to index
    %c0_76 = arith.constant 0 : index
    %c0_77 = arith.constant 0 : index
    %220 = vector.load %arg8[%219, %c0_76, %c0_77] : memref<6x16x128xf32, #tpu.memory_space<vmem>>, vector<1x16x128xf32>
    %221 = vector.shape_cast %220 : vector<1x16x128xf32> to vector<16x128xf32>
    %222 = vector.shape_cast %218 : vector<16x128xf32> to vector<1x16x128xf32>
    tpu.vector_store %arg8[%219, %c0_76, %c0_77], %222 {strides = array<i32>} : memref<6x16x128xf32, #tpu.memory_space<vmem>>, vector<1x16x128xf32>,
    %cst_78 = arith.constant dense<0xFF800000> : vector<16xf32>
    %223 = vector.multi_reduction <maximumf>, %218, %cst_78 [1] : vector<16x128xf32> to vector<16xf32>
    %224 = vector.shape_cast %223 : vector<16xf32> to vector<16x1xf32>
    %225 = vector.broadcast %224 : vector<16x1xf32> to vector<16x128xf32>
    %226 = arith.cmpf oge, %218, %225 : vector<16x128xf32>
    %c128_i32_79 = arith.constant 128 : i32
    %227 = vector.broadcast %c128_i32_79 : i32 to vector<16x128xi32>
    %228 = arith.select %226, %0, %227 : vector<16x128xi1>, vector<16x128xi32>
    %cst_80 = arith.constant dense<2147483647> : vector<16xi32>
    %229 = vector.multi_reduction <minsi>, %228, %cst_80 [1] : vector<16x128xi32> to vector<16xi32>
    %230 = vector.shape_cast %229 : vector<16xi32> to vector<16x1xi32>
    %c5_i32 = arith.constant 5 : i32
    %231 = vector.broadcast %230 : vector<16x1xi32> to vector<16x128xi32>
    %232 = arith.cmpi eq, %0, %231 : vector<16x128xi32>
    %233 = arith.extui %232 : vector<16x128xi1> to vector<16x128xi32>
    %234 = arith.sitofp %233 : vector<16x128xi32> to vector<16x128xf32>
    %235 = arith.truncf %234 : vector<16x128xf32> to vector<16x128xbf16>
    %236 = arith.truncf %212 : vector<16x128xf32> to vector<16x128xbf16>
    %237 = tpu.concatenate %235, %236 in 1 : vector<16x128xbf16>, vector<16x128xbf16> -> vector<16x256xbf16>
    %c0_81 = arith.constant 0 : index
    %c0_82 = arith.constant 0 : index
    %238 = vector.load %arg4[%c0_81, %c0_82] : memref<256x512xbf16, #tpu.memory_space<vmem>>, vector<256x512xbf16>
    %cst_83 = arith.constant dense<0.000000e+00> : vector<16x512xf32>
    %239 = tpu.matmul %237, %238, %cst_83 {dimension_numbers = #tpu.dot_dimension_numbers<[1], [0], [0], [1], [0, 0, 1, 1], [], []>} : vector<16x256xbf16>, vector<256x512xbf16>, vector<16x512xf32> -> vector<16x512xf32>
    %240 = vector.extract_strided_slice %239 {offsets = [0, 0], sizes = [16, 128], strides = [1, 1]} : vector<16x512xf32> to vector<16x128xf32>
    %241 = arith.negf %240 : vector<16x128xf32>
    %242 = math.exp %241 : vector<16x128xf32>
    %cst_84 = arith.constant 1.000000e+00 : f32
    %243 = vector.broadcast %cst_84 : f32 to vector<16x128xf32>
    %244 = arith.addf %243, %242 : vector<16x128xf32>
    %245 = arith.divf %243, %244 : vector<16x128xf32>
    %246 = vector.extract_strided_slice %239 {offsets = [0, 128], sizes = [16, 128], strides = [1, 1]} : vector<16x512xf32> to vector<16x128xf32>
    %247 = arith.negf %246 : vector<16x128xf32>
    %248 = math.exp %247 : vector<16x128xf32>
    %cst_85 = arith.constant 1.000000e+00 : f32
    %249 = vector.broadcast %cst_85 : f32 to vector<16x128xf32>
    %250 = arith.addf %249, %248 : vector<16x128xf32>
    %251 = arith.divf %249, %250 : vector<16x128xf32>
    %252 = vector.extract_strided_slice %239 {offsets = [0, 384], sizes = [16, 128], strides = [1, 1]} : vector<16x512xf32> to vector<16x128xf32>
    %c0_86 = arith.constant 0 : index
    %c0_87 = arith.constant 0 : index
    %253 = vector.load %arg5[%c0_86, %c0_87] : memref<1x128xf32, #tpu.memory_space<vmem>>, vector<1x128xf32>
    %254 = vector.broadcast %253 : vector<1x128xf32> to vector<16x128xf32>
    %255 = arith.addf %252, %254 : vector<16x128xf32>
    %256 = vector.extract_strided_slice %239 {offsets = [0, 256], sizes = [16, 128], strides = [1, 1]} : vector<16x512xf32> to vector<16x128xf32>
    %257 = arith.mulf %245, %255 : vector<16x128xf32>
    %258 = arith.addf %256, %257 : vector<16x128xf32>
    %259 = math.tanh %258 : vector<16x128xf32>
    %cst_88 = arith.constant 1.000000e+00 : f32
    %260 = vector.broadcast %cst_88 : f32 to vector<16x128xf32>
    %261 = arith.subf %260, %251 : vector<16x128xf32>
    %262 = arith.mulf %261, %259 : vector<16x128xf32>
    %263 = arith.mulf %251, %212 : vector<16x128xf32>
    %264 = arith.addf %262, %263 : vector<16x128xf32>
    %265 = arith.truncf %264 : vector<16x128xf32> to vector<16x128xbf16>
    %c0_89 = arith.constant 0 : index
    %c0_90 = arith.constant 0 : index
    %266 = vector.load %arg6[%c0_89, %c0_90] : memref<128x128xbf16, #tpu.memory_space<vmem>>, vector<128x128xbf16>
    %cst_91 = arith.constant dense<0.000000e+00> : vector<16x128xf32>
    %267 = tpu.matmul %265, %266, %cst_91 {dimension_numbers = #tpu.dot_dimension_numbers<[1], [0], [0], [1], [0, 0, 1, 1], [], []>} : vector<16x128xbf16>, vector<128x128xbf16>, vector<16x128xf32> -> vector<16x128xf32>
    %c0_92 = arith.constant 0 : index
    %c0_93 = arith.constant 0 : index
    %268 = vector.load %arg7[%c0_92, %c0_93] : memref<1x128xf32, #tpu.memory_space<vmem>>, vector<1x128xf32>
    %269 = vector.broadcast %268 : vector<1x128xf32> to vector<16x128xf32>
    %270 = arith.addf %267, %269 : vector<16x128xf32>
    %271 = arith.index_cast %c5_i32 : i32 to index
    %c0_94 = arith.constant 0 : index
    %c0_95 = arith.constant 0 : index
    %272 = vector.load %arg8[%271, %c0_94, %c0_95] : memref<6x16x128xf32, #tpu.memory_space<vmem>>, vector<1x16x128xf32>
    %273 = vector.shape_cast %272 : vector<1x16x128xf32> to vector<16x128xf32>
    %274 = vector.shape_cast %270 : vector<16x128xf32> to vector<1x16x128xf32>
    tpu.vector_store %arg8[%271, %c0_94, %c0_95], %274 {strides = array<i32>} : memref<6x16x128xf32, #tpu.memory_space<vmem>>, vector<1x16x128xf32>,
    %cst_96 = arith.constant dense<0xFF800000> : vector<16xf32>
    %275 = vector.multi_reduction <maximumf>, %270, %cst_96 [1] : vector<16x128xf32> to vector<16xf32>
    %276 = vector.shape_cast %275 : vector<16xf32> to vector<16x1xf32>
    %277 = vector.broadcast %276 : vector<16x1xf32> to vector<16x128xf32>
    %278 = arith.cmpf oge, %270, %277 : vector<16x128xf32>
    %c128_i32_97 = arith.constant 128 : i32
    %279 = vector.broadcast %c128_i32_97 : i32 to vector<16x128xi32>
    %280 = arith.select %278, %0, %279 : vector<16x128xi1>, vector<16x128xi32>
    %cst_98 = arith.constant dense<2147483647> : vector<16xi32>
    %281 = vector.multi_reduction <minsi>, %280, %cst_98 [1] : vector<16x128xi32> to vector<16xi32>
    %282 = vector.shape_cast %281 : vector<16xi32> to vector<16x1xi32>
    %c5_i32_99 = arith.constant 5 : i32
    return
  }
  func.func @transform_0(%arg0: i32) -> (i32, i32) {
    %c0_i32 = arith.constant 0 : i32
    %c0_i32_0 = arith.constant 0 : i32
    return %arg0, %c0_i32 : i32, i32
  }
  func.func @transform_1(%arg0: i32) -> (i32, i32) {
    %c0_i32 = arith.constant 0 : i32
    %c0_i32_0 = arith.constant 0 : i32
    return %arg0, %c0_i32 : i32, i32
  }
  func.func @transform_2(%arg0: i32) -> (i32, i32) {
    %c0_i32 = arith.constant 0 : i32
    %c0_i32_0 = arith.constant 0 : i32
    %c0_i32_1 = arith.constant 0 : i32
    return %c0_i32, %c0_i32_0 : i32, i32
  }
  func.func @transform_3(%arg0: i32) -> (i32, i32) {
    %c0_i32 = arith.constant 0 : i32
    %c0_i32_0 = arith.constant 0 : i32
    %c0_i32_1 = arith.constant 0 : i32
    return %c0_i32, %c0_i32_0 : i32, i32
  }
  func.func @transform_4(%arg0: i32) -> (i32, i32) {
    %c0_i32 = arith.constant 0 : i32
    %c0_i32_0 = arith.constant 0 : i32
    %c0_i32_1 = arith.constant 0 : i32
    return %c0_i32, %c0_i32_0 : i32, i32
  }
  func.func @transform_5(%arg0: i32) -> (i32, i32) {
    %c0_i32 = arith.constant 0 : i32
    %c0_i32_0 = arith.constant 0 : i32
    %c0_i32_1 = arith.constant 0 : i32
    return %c0_i32, %c0_i32_0 : i32, i32
  }
  func.func @transform_6(%arg0: i32) -> (i32, i32) {
    %c0_i32 = arith.constant 0 : i32
    %c0_i32_0 = arith.constant 0 : i32
    %c0_i32_1 = arith.constant 0 : i32
    return %c0_i32, %c0_i32_0 : i32, i32
  }
  func.func @transform_7(%arg0: i32) -> (i32, i32, i32) {
    %c0_i32 = arith.constant 0 : i32
    %c0_i32_0 = arith.constant 0 : i32
    %c0_i32_1 = arith.constant 0 : i32
    return %c0_i32, %arg0, %c0_i32_0 : i32, i32, i32
  }
}

</mosaic_0001>

<bundles_post_ra>
// kernel: tpu_custom_call.1
= control target key start
LH: loop header
LB: loop body
LE: loop exit
PB: predicated region body
PF: predicated region fallthrough
CT: control target
= control target key end

     0   :  { %12 = vsyncpa [#allocation3], 0  ;;  %s6102_s0 = inlined_call_operand.vmem [shape: s32[32,1], index: 0, kind: input, shape index: {}]   ;;  %s6103_s1 = inlined_call_operand.vmem [shape: s32[32,1], index: 1, kind: input, shape index: {}]   ;;  %s6104_s2 = inlined_call_operand.vmem [shape: f32[8,128], index: 2, kind: input, shape index: {}]   ;;  %s6105_s3 = inlined_call_operand.hbm [shape: bf16[256,512], index: 3, kind: input, shape index: {}]   ;;  %s6106_s4 = inlined_call_operand.vmem [shape: f32[1,128], index: 4, kind: input, shape index: {}]   ;;  %s6107_s5 = inlined_call_operand.vmem [shape: bf16[128,128], index: 5, kind: input, shape index: {}]   ;;  %s6108_s6 = inlined_call_operand.vmem [shape: f32[1,128], index: 6, kind: input, shape index: {}]   ;;  %s6109_s7 = inlined_call_operand.hbm [shape: f32[6,32,128], index: 7, kind: output, shape index: {}]  }
   0x1   :  { %13 = vsyncpa [#allocation4], 0 }
   0x2   :  { %15 = vsyncpa [#allocation4 + $0x1], 0  ;;  %s5131_s24 = smov 0   ;;  %s5133_s25 = smov 0  }
   0x3   :  { %s5135_s26 = smov 0   ;;  %s5137_s27 = smov 0  }
   0x4 LB: > { %s5152_s28 = sadd.s32 4294967295, %s5075_s27   ;;  %s3906_s29 = sadd.s32 4294967294, %s5075_s27   ;;  %s5075_s27 = sphi %s5137_s27, %s6197_s27   ;;  %s5071_s26 = sphi %s5135_s26, %s6196_s26   ;;  %s5067_s25 = sphi %s5133_s25, %s6195_s25   ;;  %s5063_s24 = sphi %s5131_s24, %s6194_s24  }
   0x5   : > { %s5156_s30 = sadd.s32 1, %s5075_s27   ;;  %s185_s8 = sadd.s32 1, %s5071_s26 }
   0x6   : > { %s182_s9 = ssub.s32 %s5075_s27, %s5156_s30  ;;  %p195_p0 = scmp.ne.s32.totalorder %s5071_s26, %s5067_s25 }
   0x7   : > { %p183_p1 = scmp.eq.s32.totalorder %s182_s9, 0  ;;  %p196_p2 = scmp.eq.s32.totalorder %s5152_s28, 1 }
   0x8   : > { %p201_p3 = scmp.ne.s32.totalorder %s5067_s25, %s5063_s24  ;;  %p202_p4 = scmp.eq.s32.totalorder %s3906_s29, 1 }
   0x9   : > { %s5167_s10 = scalar_select %p183_p1, %s5071_s26, %s185_s8  }
   0xa   : > { %p5169_p5 = por %p196_p2, %p195_p0  ;;  %p5173_p6 = por %p202_p4, %p201_p3 }
   0xb   : > { %p3907_p7 = scmp.ge.s32.totalorder %s5075_s27, 1  ;;  %p209_p8 = scmp.lt.s32.totalorder %s5075_s27, 3 }
   0xc   : > { %s6139_s11 = scalar_select %p5169_p5, 1, 0 }
   0xd   : > { %s6140_s12 = scalar_select %p5173_p6, 1, 0 }
   0xe   : > { %p6110_p9 = scmp.eq.s32.totalorder %s5152_s28, 0  ;;  %p5180_p10 = pnand %p3907_p7, %p209_p8 }
   0xf   : > { %s5077_s14 = smov [#allocation2]   ;;  %s5009_s19 = scalar_lea.hbm %s6105_s3, 8192 }
  0x10   : > { %s6141_s13 = scalar_select %p5180_p10, 1, 0 }
  0x11   : > { %s224_s15 = sshll.u32 %s5077_s14, 4  ;;  %p4522_p11 = pneg %p5180_p10  ;;  %s225_s15 = int_to_ptr.vmem [resolvable:$true] %s224_s15 }
  0x12   : > { %p5010_p13 = scmp.ne.s32.totalorder %s6105_s3, %s5009_s19  ;;  %p5016_p3 = scmp.lt.u32.totalorder %s5009_s19, %s6105_s3 }
  0x13   : > { %p5188_p12 = pnand %p6110_p9, %p4522_p11 }
  0x15   : > { %p5011_p0 = pneg %p5188_p12 }
  0x17   : > { %p5012_p1 = pnand %p5011_p0, %p5010_p13 }
  0x19   : > { %p5013_p2 = pneg %p5012_p1 }
  0x1b   : > { %p5018_p4 = pnand %p5016_p3, %p5013_p2 }
  0x1d   : > { %5021 = shalt.err (!%p5018_p4)
}
  0x1e   : > { %s5022_s29 = scalar_lea.vmem %s225_s15, 8192  ;;  %p5030_p9 = scmp.lt.s32.totalorder %s225_s15, %s225_s15 }
  0x1f   : > { %p5023_p7 = scmp.ne.s32.totalorder %s225_s15, %s5022_s29  ;;  %p5031_p6 = scmp.lt.s32.totalorder %s5022_s29, %s5022_s29 }
  0x21   : > { %p5025_p8 = pnand %p5023_p7, %p5011_p0  ;;  %p5032_p5 = por %p5031_p6, %p5030_p9 }
  0x23   : > { %p5026_p11 = pneg %p5025_p8 }
  0x25   : > { %p5033_p10 = pnand %p5032_p5, %p5026_p11 }
  0x27   : > { %5036 = shalt.err (!%p5033_p10)
}
  0x28   : > { %s5078_s8 = smov 256   ;;  %s5079_s9 = smov 16  }
  0x29   : > { %4525 = dma.hbm_to_vmem [thread:$0]  (!%p5188_p12), %s6105_s3, 8192, %s225_s15, [#allocation3], %s5078_s8, %s5078_s8, %s5079_s9  }
  0x2a   : > { %p6143_p13 = scmp.ne.s32.totalorder %s6141_s13, 0 }
  0x2c   : > { %267 = sbr.rel (%p6143_p13) target bundleno = 4573 (0x11dd), region = 48 }
  0x33   : > { %p6144_p1 = scmp.eq.s32.totalorder %s5152_s28, 0 }
  0x35   : > { %5054 = dma.done.wait (%p6144_p1), [#allocation3], 8192   ;;  %p6145_p0 = pmov %p6144_p1 }
  0x36   : > { %s3912_s18 = sshll.u32 %s5152_s28, 1  ;;  %v5080_v0 = vmov 0   ;;  %v350_v5 = vld [vmem:[%s6104_s2] sm:$0xff]  ;;  %v5237_v11 = vld [vmem:[#allocation2 + $0xc] ss:$16 sps:$4 sm:$0xff]   ;;  %v318_v37 = vlaneseq  ;;  %vm351_vm4 = vcmask 64512  }
  0x37   : > { %5056 = vsyncadd (%p6145_p0), [#allocation3], 4294959104  ;;  %4580 = vset.pattern.permute.xlu1 %v5080_v0  ;;  %4579 = vset.pattern.permute.xlu0 %v5080_v0  ;;  %p305_p5 = scmp.lt.s32.totalorder %s3912_s18, 3  ;;  %v5224_v6 = vld [vmem:[#allocation2 + $0x4] ss:$16 sps:$4 sm:$0xff]   ;;  %v6113_v43 = vmov 0.0  }
  0x38   : > { %4404 = vmatprep.subr.mxu0 %v350_v5  ;;  %v5226_v7 = vld [vmem:[#allocation2] ss:$16 sps:$4 sm:$0xff]   ;;  %v5228_v8 = vld [vmem:[#allocation2 + $0x24] ss:$16 sps:$4 sm:$0xff]   ;;  %824 = vmatprep.subr.bf16.mxu1 %v5224_v6  ;;  %v5317_v38 = vand.u32 127, %v318_v37  ;;  %s301_s8 = sand.u32 1, %s5067_s25  }
  0x39   : > { %s6199_s18 = smov (!%p305_p5, %s3912_s18), 3  ;;  %4405 = vmatpush3.msra.mxu0 %v350_v5  ;;  %825 = vmatpush1.bf16.msra.mxu1 %v5226_v7  ;;  %v5232_v9 = vld [vmem:[#allocation2 + $0x20] ss:$16 sps:$4 sm:$0xff]   ;;  %v5235_v10 = vld [vmem:[#allocation2 + $0x44] ss:$16 sps:$4 sm:$0xff]   ;;  %s4509_s9 = smul.u32 96, %s301_s8 }
  0x3a   : > { %s3913_s16 = sshll.u32 %s6199_s18, 3  ;;  %826 = vmatprep.subr.bf16.mxu1 %v5228_v8  ;;  %v5239_v12 = vld [vmem:[#allocation2 + $0x40] ss:$16 sps:$4 sm:$0xff]   ;;  %867 = vmatprep.subr.bf16.mxu0 %v5237_v11  ;;  %v5243_v13 = vld [vmem:[#allocation2 + $0x64] ss:$16 sps:$4 sm:$0xff]   ;;  %vm433_vm5 = vcmp.eq.s32.totalorder %v5317_v38, 1 }
  0x3b   : > { %s308_s15 = scalar_lea.vmem %s6102_s0, %s3913_s16  ;;  %s314_s22 = scalar_lea.vmem %s6103_s1, %s3913_s16  ;;  %v5246_v14 = vld [vmem:[#allocation2 + $0x60] ss:$16 sps:$4 sm:$0xff]   ;;  %v5248_v15 = vld [vmem:[#allocation2 + $0x84] ss:$16 sps:$4 sm:$0xff]   ;;  %v5327_v50 = vld [vmem:[#allocation2 + $0x8] ss:$16 sps:$4 sm:$0xff]  }
  0x3c   : > { %v321_v1 = vld [vmem:[%s308_s15 + $0x8] sm:$0xff]  ;;  %v320_v2 = vld [vmem:[%s308_s15] sm:$0xff]  ;;  %s5417_s14 = scalar_lea.vmem [#allocation5], %s4509_s9  ;;  %vm3987_vm6 = vmpackc.low %vm433_vm5, %vm433_vm5  ;;  %vm5083_vm7 = vmmov 0  }
  0x3d   : > { %v335_v3 = vld [vmem:[%s314_s22 + $0x8] sm:$0xff]  ;;  %326 = vperm.xlu1 %4580, %v321_v1   ;;  %323 = vperm.xlu0 %4579, %v320_v2   ;;  %v334_v4 = vld [vmem:[%s314_s22] sm:$0xff]  ;;  %s3778_s22 = scalar_lea.sflag [#allocation4], %s301_s8 }
  0x3e   : > { %827 = vmatpush1.bf16.msra.mxu1 %v5232_v9  ;;  %v5252_v16 = vld [vmem:[#allocation2 + $0x80] ss:$16 sps:$4 sm:$0xff]   ;;  %v5254_v17 = vld [vmem:[#allocation2 + $0xa4] ss:$16 sps:$4 sm:$0xff]   ;;  %v5329_v51 = vld [vmem:[#allocation2 + $0x2c] ss:$16 sps:$4 sm:$0xff]  }
  0x3f   : > { %828 = vmatprep.subr.bf16.mxu1 %v5235_v10  ;;  %v5258_v18 = vld [vmem:[#allocation2 + $0xa0] ss:$16 sps:$4 sm:$0xff]   ;;  %v5260_v19 = vld [vmem:[#allocation2 + $0xc4] ss:$16 sps:$4 sm:$0xff]   ;;  %v5332_v52 = vld [vmem:[#allocation2 + $0x28] ss:$16 sps:$4 sm:$0xff]  }
  0x40   : > { %v5264_v20 = vld [vmem:[#allocation2 + $0xc0] ss:$16 sps:$4 sm:$0xff]   ;;  %v5266_v21 = vld [vmem:[#allocation2 + $0xe4] ss:$16 sps:$4 sm:$0xff]   ;;  %v5335_v53 = vld [vmem:[#allocation2 + $0x4c] ss:$16 sps:$4 sm:$0xff]  }
  0x41   : > { %340 = vperm.xlu1 %4580, %v335_v3   ;;  %337 = vperm.xlu0 %4579, %v334_v4   ;;  %v5270_v22 = vld [vmem:[#allocation2 + $0xe0] ss:$16 sps:$4 sm:$0xff]   ;;  %v5272_v23 = vld [vmem:[#allocation2 + $0x104] ss:$16 sps:$4 sm:$0xff]   ;;  %v5338_v54 = vld [vmem:[#allocation2 + $0x48] ss:$16 sps:$4 sm:$0xff]  }
  0x42   : > { %829 = vmatpush1.bf16.msra.mxu1 %v5239_v12  ;;  %v5276_v24 = vld [vmem:[#allocation2 + $0x100] ss:$16 sps:$4 sm:$0xff]   ;;  %v5278_v25 = vld [vmem:[#allocation2 + $0x124] ss:$16 sps:$4 sm:$0xff]   ;;  %v5341_v55 = vld [vmem:[#allocation2 + $0x6c] ss:$16 sps:$4 sm:$0xff]  }
  0x43   : > { %830 = vmatprep.subr.bf16.mxu1 %v5243_v13  ;;  %v5282_v26 = vld [vmem:[#allocation2 + $0x120] ss:$16 sps:$4 sm:$0xff]   ;;  %v5284_v27 = vld [vmem:[#allocation2 + $0x144] ss:$16 sps:$4 sm:$0xff]   ;;  %v5344_v56 = vld [vmem:[#allocation2 + $0x68] ss:$16 sps:$4 sm:$0xff]  }
  0x44   : > { %v5288_v28 = vld [vmem:[#allocation2 + $0x140] ss:$16 sps:$4 sm:$0xff]   ;;  %v5290_v29 = vld [vmem:[#allocation2 + $0x164] ss:$16 sps:$4 sm:$0xff]   ;;  %v5347_v57 = vld [vmem:[#allocation2 + $0x8c] ss:$16 sps:$4 sm:$0xff]  }
  0x45   : > { %v5294_v30 = vld [vmem:[#allocation2 + $0x160] ss:$16 sps:$4 sm:$0xff]   ;;  %v5296_v31 = vld [vmem:[#allocation2 + $0x184] ss:$16 sps:$4 sm:$0xff]   ;;  %v5350_v58 = vld [vmem:[#allocation2 + $0x88] ss:$16 sps:$4 sm:$0xff]  }
  0x46   : > { %831 = vmatpush1.bf16.msra.mxu1 %v5246_v14  ;;  %v5300_v32 = vld [vmem:[#allocation2 + $0x180] ss:$16 sps:$4 sm:$0xff]   ;;  %v5302_v33 = vld [vmem:[#allocation2 + $0x1a4] ss:$16 sps:$4 sm:$0xff]   ;;  %v5353_v59 = vld [vmem:[#allocation2 + $0xac] ss:$16 sps:$4 sm:$0xff]  }
  0x47   : > { %832 = vmatprep.subr.bf16.mxu1 %v5248_v15  ;;  %v5306_v34 = vld [vmem:[#allocation2 + $0x1a0] ss:$16 sps:$4 sm:$0xff]   ;;  %v5308_v35 = vld [vmem:[#allocation2 + $0x1c4] ss:$16 sps:$4 sm:$0xff]   ;;  %v5356_v60 = vld [vmem:[#allocation2 + $0xa8] ss:$16 sps:$4 sm:$0xff]  }
  0x48   : > { %v5312_v36 = vld [vmem:[#allocation2 + $0x1c0] ss:$16 sps:$4 sm:$0xff]   ;;  %v5359_v61 = vld [vmem:[#allocation2 + $0xcc] ss:$16 sps:$4 sm:$0xff]   ;;  %v5362_v62 = vld [vmem:[#allocation2 + $0xc8] ss:$16 sps:$4 sm:$0xff]  }
  0x49   : > { %v5365_v63 = vld [vmem:[#allocation2 + $0xec] ss:$16 sps:$4 sm:$0xff]   ;;  %v5368_v0 = vld [vmem:[#allocation2 + $0xe8] ss:$16 sps:$4 sm:$0xff]   ;;  %v5384_v5 = vld [vmem:[#allocation2 + $0x1e4] ss:$16 sps:$4 sm:$0xff]  }
  0x4a   : > { %833 = vmatpush1.bf16.msra.mxu1 %v5252_v16  ;;  %v5371_v1 = vld [vmem:[#allocation2 + $0x10c] ss:$16 sps:$4 sm:$0xff]   ;;  %v5374_v2 = vld [vmem:[#allocation2 + $0x108] ss:$16 sps:$4 sm:$0xff]  }
  0x4b   : > { %834 = vmatprep.subr.bf16.mxu1 %v5254_v17  ;;  %v5377_v3 = vld [vmem:[#allocation2 + $0x12c] ss:$16 sps:$4 sm:$0xff]   ;;  %v5380_v4 = vld [vmem:[#allocation2 + $0x128] ss:$16 sps:$4 sm:$0xff]  }
  0x4c   : > { %v5386_v37 = vld [vmem:[#allocation2 + $0x14c] ss:$16 sps:$4 sm:$0xff]  }
  0x4e   : > { %835 = vmatpush1.bf16.msra.mxu1 %v5258_v18 }
  0x4f   : > { %836 = vmatprep.subr.bf16.mxu1 %v5260_v19 }
  0x52   : > { %837 = vmatpush1.bf16.msra.mxu1 %v5264_v20 }
  0x53   : > { %838 = vmatprep.subr.bf16.mxu1 %v5266_v21 }
  0x56   : > { %839 = vmatpush1.bf16.msra.mxu1 %v5270_v22 }
  0x57   : > { %840 = vmatprep.subr.bf16.mxu1 %v5272_v23 }
  0x5a   : > { %841 = vmatpush1.bf16.msra.mxu1 %v5276_v24 }
  0x5b   : > { %842 = vmatprep.subr.bf16.mxu1 %v5278_v25 }
  0x5e   : > { %843 = vmatpush1.bf16.msra.mxu1 %v5282_v26 }
  0x5f   : > { %844 = vmatprep.subr.bf16.mxu1 %v5284_v27 }
  0x62   : > { %845 = vmatpush1.bf16.msra.mxu1 %v5288_v28 }
  0x63   : > { %846 = vmatprep.subr.bf16.mxu1 %v5290_v29 }
  0x66   : > { %847 = vmatpush1.bf16.msra.mxu1 %v5294_v30 }
  0x67   : > { %848 = vmatprep.subr.bf16.mxu1 %v5296_v31 }
  0x6a   : > { %849 = vmatpush1.bf16.msra.mxu1 %v5300_v32 }
  0x6b   : > { %850 = vmatprep.subr.bf16.mxu1 %v5302_v33 }
  0x6e   : > { %851 = vmatpush1.bf16.msra.mxu1 %v5306_v34 }
  0x6f   : > { %852 = vmatprep.subr.bf16.mxu1 %v5308_v35 }
  0x72   : > { %853 = vmatpush1.bf16.msra.mxu1 %v5312_v36 }
  0x73   : > { %854 = vmatprep.subr.bf16.mxu1 %v5384_v5 }
  0xbc   : > { %v327_v39 = vpop.permute.xlu1 %326  ;;  %v324_v40 = vpop.permute.xlu0 %323 }
  0xbd   : > { %vm329_vm0 = vcmp.eq.s32.totalorder %v5317_v38, %v327_v39  ;;  %vm328_vm1 = vcmp.eq.s32.totalorder %v5317_v38, %v324_v40  ;;  %v5388_v39 = vld [vmem:[#allocation2 + $0x148] ss:$16 sps:$4 sm:$0xff]   ;;  %v5390_v40 = vld [vmem:[#allocation2 + $0x1e0] ss:$16 sps:$4 sm:$0xff]  }
  0xbe   : > { %v3917_v44 = vsel %vm329_vm0, 1.0, %v6113_v43  ;;  %v3916_v45 = vsel %vm328_vm1, 1.0, %v6113_v43  ;;  %855 = vmatpush1.bf16.msra.mxu1 %v5390_v40 }
  0xbf   : > { %4409 = vmatprep.subr.bf16.mxu1 %v6113_v43 }
  0xc0   : > { %v341_v41 = vpop.permute.xlu1 %340  ;;  %v338_v42 = vpop.permute.xlu0 %337 }
  0xc1   : > { %vm343_vm2 = vcmp.eq.s32.totalorder %v5317_v38, %v341_v41  ;;  %vm342_vm3 = vcmp.eq.s32.totalorder %v5317_v38, %v338_v42  ;;  %v5396_v41 = vld [vmem:[#allocation2 + $0x16c] ss:$16 sps:$4 sm:$0xff]   ;;  %v5401_v42 = vld [vmem:[#allocation2 + $0x168] ss:$16 sps:$4 sm:$0xff]  }
  0xc2   : > { %v3919_v46 = vsel %vm343_vm2, 1.0, %v6113_v43  ;;  %v3918_v47 = vsel %vm342_vm3, 1.0, %v6113_v43  ;;  %6146 = vst [vmem:[#allocation10_spill] sm:$0xff] %v5401_v42 }
  0xc3   : > { %v349_v48 = vsub.f32 %v3917_v44, %v3919_v46  ;;  %v348_v49 = vsub.f32 %v3916_v45, %v3918_v47  ;;  %v3922_v44 = vsel %vm433_vm5, 1.0, %v6113_v43  ;;  %v5409_v45 = vld [vmem:[#allocation2 + $0x18c] ss:$16 sps:$4 sm:$0xff]   ;;  %v5412_v46 = vld [vmem:[#allocation2 + $0x188] ss:$16 sps:$4 sm:$0xff]  }
  0xc4   : > { %6147 = vst [vmem:[#allocation11_spill] sm:$0xff] %v5409_v45  ;;  %v5415_v47 = vld [vmem:[#allocation2 + $0x1ac] ss:$16 sps:$4 sm:$0xff]   ;;  %436 = vst [vmem:[%s5417_s14] sm:$0xff] %v3922_v44  ;;  %v5428_v43 = vld [vmem:[#allocation2 + $0x1c8] ss:$16 sps:$4 sm:$0xff]  }
  0xc5   : > { %4406 = vmatprep.mubr.msk.f32.mxu0 %vm351_vm4, %v348_v49  ;;  %6148 = vst [vmem:[#allocation12_spill] sm:$0xff] %v5415_v47  ;;  %437 = vst [vmem:[%s5417_s14 + $0x8] sm:$0xff] %v3922_v44  ;;  %v5425_v49 = vld [vmem:[#allocation2 + $0x1cc] ss:$16 sps:$4 sm:$0xff]  }
  0xc6   : > { %4407 = vmatmul.mubr.msk.f32.vlgmr.msra.gmra.mrb[0].mxu0 %vm351_vm4, %v349_v48  ;;  %v5422_v48 = vld [vmem:[#allocation2 + $0x1a8] ss:$16 sps:$4 sm:$0xff]   ;;  %6150 = vst [vmem:[#allocation14_spill] sm:$0xff] %v5428_v43 }
  0xc7   : > { %868 = vmatpush1.bf16.msra.mxu0 %v5327_v50  ;;  %6149 = vst [vmem:[#allocation13_spill] sm:$0xff] %v5422_v48 }
  0xc8   : > { %869 = vmatprep.subr.bf16.mxu0 %v5329_v51 }
  0xcb   : > { %870 = vmatpush1.bf16.msra.mxu0 %v5332_v52 }
  0xcc   : > { %871 = vmatprep.subr.bf16.mxu0 %v5335_v53 }
  0xcf   : > { %872 = vmatpush1.bf16.msra.mxu0 %v5338_v54 }
  0xd0   : > { %873 = vmatprep.subr.bf16.mxu0 %v5341_v55 }
  0xd3   : > { %874 = vmatpush1.bf16.msra.mxu0 %v5344_v56 }
  0xd4   : > { %875 = vmatprep.subr.bf16.mxu0 %v5347_v57 }
  0xd7   : > { %876 = vmatpush1.bf16.msra.mxu0 %v5350_v58 }
  0xd8   : > { %877 = vmatprep.subr.bf16.mxu0 %v5353_v59 }
  0xdb   : > { %878 = vmatpush1.bf16.msra.mxu0 %v5356_v60 }
  0xdc   : > { %879 = vmatprep.subr.bf16.mxu0 %v5359_v61 }
  0xdf   : > { %880 = vmatpush1.bf16.msra.mxu0 %v5362_v62 }
  0xe0   : > { %881 = vmatprep.subr.bf16.mxu0 %v5365_v63 }
  0xe3   : > { %882 = vmatpush1.bf16.msra.mxu0 %v5368_v0 }
  0xe4   : > { %883 = vmatprep.subr.bf16.mxu0 %v5371_v1 }
  0xe7   : > { %884 = vmatpush1.bf16.msra.mxu0 %v5374_v2 }
  0xe8   : > { %885 = vmatprep.subr.bf16.mxu0 %v5377_v3 }
  0xeb   : > { %886 = vmatpush1.bf16.msra.mxu0 %v5380_v4 }
  0xec   : > { %887 = vmatprep.subr.bf16.mxu0 %v5386_v37 }
  0xef   : > { %888 = vmatpush1.bf16.msra.mxu0 %v5388_v39 }
  0xf0   : > { %889 = vmatprep.subr.bf16.mxu0 %v5396_v41 }
  0xf3   : > { %890 = vmatpush1.bf16.msra.mxu0 %v5401_v42  ;;  %v5434_v42 = vld [vmem:[#allocation2 + $0x1e8] ss:$16 sps:$4 sm:$0xff]  }
  0xf4   : > { %891 = vmatprep.subr.bf16.mxu0 %v5409_v45  ;;  %v5431_v45 = vld [vmem:[#allocation2 + $0x1ec] ss:$16 sps:$4 sm:$0xff]  }
  0xf7   : > { %892 = vmatpush1.bf16.msra.mxu0 %v5412_v46 }
  0xf8   : > { %893 = vmatprep.subr.bf16.mxu0 %v5415_v47 }
  0xfb   : > { %894 = vmatpush1.bf16.msra.mxu0 %v5422_v48 }
  0xfc   : > { %895 = vmatprep.subr.bf16.mxu0 %v5425_v49 }
  0xff   : > { %896 = vmatpush1.bf16.msra.mxu0 %v5428_v43  ;;  %v6120_v43 = vmov 1.0|1.0  }
 0x100   : > { %897 = vmatprep.subr.bf16.mxu0 %v5431_v45 }
 0x103   : > { %898 = vmatpush1.bf16.msra.mxu0 %v5434_v42 }
 0x104   : > { %1500 = vmatprep.subr.bf16.mxu0 %v5224_v6  ;;  %v6151_v6 = vmov 0.0  }
 0x199   : > { %v5439_v44 = vpop.f32.mrb[0].mxu0 }
 0x19a   : > { %v5441_v47 = vpop.f32.mrb[1].mxu0 }
 0x19b   : > { %v439_v48 = vpack.c.bf16 %v5439_v44, %v5441_v47 }
 0x19d   : > { %856 = vmatprep.mubr.bf16.mxu1 %v439_v48  ;;  %899 = vmatprep.mubr.bf16.mxu0 %v439_v48 }
 0x19e   : > { %3988 = vmatmul.mubr.msk.bf16.vlgmr.msra.gmra.mrb[0].mxu1 %vm3987_vm6, %v6120_v43  ;;  %3990 = vmatmul.mubr.msk.bf16.vlgmr.msra.gmra.mrb[4].mxu0 %vm3987_vm6, %v6120_v43 }
 0x19f   : > { %1501 = vmatpush1.bf16.msra.mxu0 %v5226_v7  ;;  %v4677_v7 = vld [vmem:[%s6107_s5] sm:$0xff]   ;;  %4425 = vmatprep.mubr.msk.bf16.mxu1 %vm5083_vm7, %v6151_v6 }
 0x1a0   : > { %1502 = vmatprep.subr.bf16.mxu0 %v5228_v8  ;;  %4410 = vmatpush3.bf16.msra.mxu1 %v4677_v7  ;;  %v4678_v8 = vld [vmem:[%s6107_s5 + $0x8] sm:$0xff]  }
 0x1a1   : > { %4411 = vmatprep.subr.bf16.mxu1 %v6151_v6 }
 0x1a3   : > { %1503 = vmatpush1.bf16.msra.mxu0 %v5232_v9  ;;  %v4679_v9 = vld [vmem:[%s6107_s5 + $0x10] sm:$0xff]  }
 0x1a4   : > { %1504 = vmatprep.subr.bf16.mxu0 %v5235_v10  ;;  %4412 = vmatpush3.bf16.msra.mxu1 %v4678_v8  ;;  %v4680_v10 = vld [vmem:[%s6107_s5 + $0x18] sm:$0xff]  }
 0x1a5   : > { %4413 = vmatprep.subr.bf16.mxu1 %v6151_v6 }
 0x1a7   : > { %1505 = vmatpush1.bf16.msra.mxu0 %v5239_v12  ;;  %v4681_v12 = vld [vmem:[%s6107_s5 + $0x20] sm:$0xff]  }
 0x1a8   : > { %1506 = vmatprep.subr.bf16.mxu0 %v5243_v13  ;;  %4414 = vmatpush3.bf16.msra.mxu1 %v4679_v9  ;;  %v4682_v13 = vld [vmem:[%s6107_s5 + $0x28] sm:$0xff]  }
 0x1a9   : > { %4415 = vmatprep.subr.bf16.mxu1 %v6151_v6 }
 0x1ab   : > { %1507 = vmatpush1.bf16.msra.mxu0 %v5246_v14  ;;  %v4683_v14 = vld [vmem:[%s6107_s5 + $0x30] sm:$0xff]  }
 0x1ac   : > { %1508 = vmatprep.subr.bf16.mxu0 %v5248_v15  ;;  %4416 = vmatpush3.bf16.msra.mxu1 %v4680_v10  ;;  %v4684_v15 = vld [vmem:[%s6107_s5 + $0x38] sm:$0xff]  }
 0x1ad   : > { %4417 = vmatprep.subr.bf16.mxu1 %v6151_v6 }
 0x1af   : > { %1509 = vmatpush1.bf16.msra.mxu0 %v5252_v16 }
 0x1b0   : > { %1510 = vmatprep.subr.bf16.mxu0 %v5254_v17  ;;  %4418 = vmatpush3.bf16.msra.mxu1 %v4681_v12 }
 0x1b1   : > { %4419 = vmatprep.subr.bf16.mxu1 %v6151_v6 }
 0x1b3   : > { %1511 = vmatpush1.bf16.msra.mxu0 %v5258_v18 }
 0x1b4   : > { %1512 = vmatprep.subr.bf16.mxu0 %v5260_v19  ;;  %4420 = vmatpush3.bf16.msra.mxu1 %v4682_v13 }
 0x1b5   : > { %4421 = vmatprep.subr.bf16.mxu1 %v6151_v6 }
 0x1b7   : > { %1513 = vmatpush1.bf16.msra.mxu0 %v5264_v20 }
 0x1b8   : > { %1514 = vmatprep.subr.bf16.mxu0 %v5266_v21  ;;  %4422 = vmatpush3.bf16.msra.mxu1 %v4683_v14 }
 0x1b9   : > { %4423 = vmatprep.subr.bf16.mxu1 %v6151_v6 }
 0x1bb   : > { %1515 = vmatpush1.bf16.msra.mxu0 %v5270_v22 }
 0x1bc   : > { %1516 = vmatprep.subr.bf16.mxu0 %v5272_v23  ;;  %4424 = vmatpush3.bf16.msra.mxu1 %v4684_v15 }
 0x1bd   : > { %1543 = vmatprep.subr.bf16.mxu1 %v5237_v11 }
 0x1bf   : > { %1517 = vmatpush1.bf16.msra.mxu0 %v5276_v24 }
 0x1c0   : > { %1518 = vmatprep.subr.bf16.mxu0 %v5278_v25 }
 0x1c3   : > { %1519 = vmatpush1.bf16.msra.mxu0 %v5282_v26 }
 0x1c4   : > { %1520 = vmatprep.subr.bf16.mxu0 %v5284_v27 }
 0x1c7   : > { %1521 = vmatpush1.bf16.msra.mxu0 %v5288_v28 }
 0x1c8   : > { %1522 = vmatprep.subr.bf16.mxu0 %v5290_v29 }
 0x1cb   : > { %1523 = vmatpush1.bf16.msra.mxu0 %v5294_v30 }
 0x1cc   : > { %1524 = vmatprep.subr.bf16.mxu0 %v5296_v31 }
 0x1cf   : > { %1525 = vmatpush1.bf16.msra.mxu0 %v5300_v32 }
 0x1d0   : > { %1526 = vmatprep.subr.bf16.mxu0 %v5302_v33 }
 0x1d3   : > { %1527 = vmatpush1.bf16.msra.mxu0 %v5306_v34 }
 0x1d4   : > { %1528 = vmatprep.subr.bf16.mxu0 %v5308_v35  ;;  %v5519_v35 = vld [vmem:[%s6106_s4] ss:$0 sm:$0xff] }
 0x1d7   : > { %1529 = vmatpush1.bf16.msra.mxu0 %v5312_v36 }
 0x1d8   : > { %1530 = vmatprep.subr.bf16.mxu0 %v5384_v5 }
 0x1db   : > { %1531 = vmatpush1.bf16.msra.mxu0 %v5390_v40 }
 0x1dc   : > { %4429 = vmatprep.subr.bf16.mxu0 %v6151_v6 }
 0x271   : > { %v858_v16 = vpop.f32.mrb[0].mxu1  ;;  %v901_v17 = vpop.f32.mrb[4].mxu0 }
 0x272   : > { %v3991_v18 = vmul.f32 -1.442695, %v858_v16  ;;  %v860_v19 = vpop.f32.mrb[1].mxu1  ;;  %v903_v20 = vpop.f32.mrb[5].mxu0 }
 0x273   : > { %v3993_v21 = vmul.f32 -1.442695, %v860_v19  ;;  %v862_v22 = vpop.f32.mrb[2].mxu1  ;;  %v905_v23 = vpop.f32.mrb[6].mxu0  ;;  %v941_v36 = vadd.f32 %v5519_v35, %v903_v20 }
 0x274   : > { %4909 = vpow2.f32 %v3991_v18  ;;  %v3992_v24 = vmul.f32 -1.442695, %v862_v22  ;;  %v864_v25 = vpop.f32.mrb[3].mxu1  ;;  %v907_v26 = vpop.f32.mrb[7].mxu0 }
 0x275   : > { %4911 = vpow2.f32 %v3993_v21  ;;  %v3994_v27 = vmul.f32 -1.442695, %v864_v25  ;;  %v942_v7 = vadd.f32 %v5519_v35, %v907_v26 }
 0x276   : > { %4913 = vpow2.f32 %v3992_v24 }
 0x277   : > { %4915 = vpow2.f32 %v3994_v27 }
 0x27e   : > { %v4910_v28 = vpop.eup %4909 }
 0x27f   : > { %v4912_v29 = vpop.eup %4911  ;;  %v916_v30 = vadd.f32 1.0, %v4910_v28 }
 0x280   : > { %v4914_v11 = vpop.eup %4913  ;;  %v928_v31 = vadd.f32 1.0, %v4912_v29 }
 0x281   : > { %v4916_v32 = vpop.eup %4915  ;;  %4917 = vrcp.f32 %v916_v30  ;;  %v917_v33 = vadd.f32 1.0, %v4914_v11 }
 0x282   : > { %4919 = vrcp.f32 %v928_v31  ;;  %v929_v34 = vadd.f32 1.0, %v4916_v32 }
 0x283   : > { %4921 = vrcp.f32 %v917_v33 }
 0x284   : > { %4923 = vrcp.f32 %v929_v34  ;;  %v4685_v34 = vld [vmem:[%s6107_s5] sm:$0xff]  }
 0x28b   : > { %v4918_v5 = vpop.eup %4917 }
 0x28c   : > { %v4920_v40 = vpop.eup %4919  ;;  %v943_v48 = vmul.f32 %v4918_v5, %v941_v36  ;;  %v4686_v36 = vld [vmem:[%s6107_s5 + $0x8] sm:$0xff]   ;;  %v4687_v5 = vld [vmem:[%s6107_s5 + $0x10] sm:$0xff]  }
 0x28d   : > { %v4922_v8 = vpop.eup %4921  ;;  %v953_v9 = vmul.f32 %v4920_v40, %v5441_v47  ;;  %v949_v16 = vsub.f32 1.0, %v4920_v40  ;;  %v4688_v40 = vld [vmem:[%s6107_s5 + $0x18] sm:$0xff]  }
 0x28e   : > { %v4924_v10 = vpop.eup %4923  ;;  %v945_v12 = vadd.f32 %v943_v48, %v901_v17  ;;  %v944_v13 = vmul.f32 %v4922_v8, %v942_v7  ;;  %v4689_v48 = vld [vmem:[%s6107_s5 + $0x20] sm:$0xff]   ;;  %v4690_v7 = vld [vmem:[%s6107_s5 + $0x28] sm:$0xff]   ;;  %v4691_v8 = vld [vmem:[%s6107_s5 + $0x30] sm:$0xff]  }
 0x28f   : > { %v954_v14 = vmul.f32 %v4924_v10, %v5439_v44  ;;  %v950_v19 = vsub.f32 1.0, %v4924_v10 }
 0x290   : > { %4925 = vtanh.f32 %v945_v12  ;;  %v946_v15 = vadd.f32 %v944_v13, %v905_v23 }
 0x292   : > { %4927 = vtanh.f32 %v946_v15 }
 0x29a   : > { %v4926_v18 = vpop.eup %4925 }
 0x29b   : > { %v951_v20 = vmul.f32 %v4926_v18, %v949_v16 }
 0x29c   : > { %v4928_v21 = vpop.eup %4927 }
 0x29d   : > { %v952_v22 = vmul.f32 %v4928_v21, %v950_v19  ;;  %v5525_v24 = vadd.f32 %v953_v9, %v951_v20  ;;  %v4692_v9 = vld [vmem:[%s6107_s5 + $0x38] sm:$0xff]  }
 0x29f   : > { %v5527_v25 = vadd.f32 %v954_v14, %v952_v22 }
 0x2a1   : > { %v957_v47 = vpack.c.bf16 %v5527_v25, %v5525_v24 }
 0x2a3   : > { %4426 = vmatmul.mubr.bf16.vlgmr.msra.gmra.mrb[4].mxu1 %v957_v47  ;;  %1532 = vmatprep.mubr.bf16.mxu0 %v957_v47 }
 0x2a4   : > { %1575 = vmatprep.mubr.bf16.mxu1 %v957_v47  ;;  %1544 = vmatpush1.bf16.msra.mxu1 %v5327_v50  ;;  %v6152_v50 = vld [vmem:[#allocation10_spill] sm:$0xff] }
 0x2a5   : > { %1545 = vmatprep.subr.bf16.mxu1 %v5329_v51  ;;  %v6153_v51 = vld [vmem:[#allocation11_spill] sm:$0xff] }
 0x2a8   : > { %1546 = vmatpush1.bf16.msra.mxu1 %v5332_v52  ;;  %v6154_v52 = vld [vmem:[#allocation12_spill] sm:$0xff] }
 0x2a9   : > { %1547 = vmatprep.subr.bf16.mxu1 %v5335_v53  ;;  %v6155_v53 = vld [vmem:[#allocation13_spill] sm:$0xff] }
 0x2ac   : > { %1548 = vmatpush1.bf16.msra.mxu1 %v5338_v54  ;;  %v6156_v54 = vld [vmem:[#allocation14_spill] sm:$0xff] }
 0x2ad   : > { %1549 = vmatprep.subr.bf16.mxu1 %v5341_v55  ;;  %v5565_v55 = vld [vmem:[%s6108_s6] ss:$0 sm:$0xff] }
 0x2b0   : > { %1550 = vmatpush1.bf16.msra.mxu1 %v5344_v56 }
 0x2b1   : > { %1551 = vmatprep.subr.bf16.mxu1 %v5347_v57 }
 0x2b4   : > { %1552 = vmatpush1.bf16.msra.mxu1 %v5350_v58 }
 0x2b5   : > { %1553 = vmatprep.subr.bf16.mxu1 %v5353_v59 }
 0x2b8   : > { %1554 = vmatpush1.bf16.msra.mxu1 %v5356_v60 }
 0x2b9   : > { %1555 = vmatprep.subr.bf16.mxu1 %v5359_v61 }
 0x2bc   : > { %1556 = vmatpush1.bf16.msra.mxu1 %v5362_v62 }
 0x2bd   : > { %1557 = vmatprep.subr.bf16.mxu1 %v5365_v63 }
 0x2c0   : > { %1558 = vmatpush1.bf16.msra.mxu1 %v5368_v0 }
 0x2c1   : > { %1559 = vmatprep.subr.bf16.mxu1 %v5371_v1 }
 0x2c4   : > { %1560 = vmatpush1.bf16.msra.mxu1 %v5374_v2 }
 0x2c5   : > { %1561 = vmatprep.subr.bf16.mxu1 %v5377_v3 }
 0x2c8   : > { %1562 = vmatpush1.bf16.msra.mxu1 %v5380_v4 }
 0x2c9   : > { %1563 = vmatprep.subr.bf16.mxu1 %v5386_v37 }
 0x2cc   : > { %1564 = vmatpush1.bf16.msra.mxu1 %v5388_v39 }
 0x2cd   : > { %1565 = vmatprep.subr.bf16.mxu1 %v5396_v41 }
 0x2d0   : > { %1566 = vmatpush1.bf16.msra.mxu1 %v6152_v50 }
 0x2d1   : > { %1567 = vmatprep.subr.bf16.mxu1 %v6153_v51 }
 0x2d4   : > { %1568 = vmatpush1.bf16.msra.mxu1 %v5412_v46 }
 0x2d5   : > { %1569 = vmatprep.subr.bf16.mxu1 %v6154_v52 }
 0x2d8   : > { %1570 = vmatpush1.bf16.msra.mxu1 %v6155_v53 }
 0x2d9   : > { %1571 = vmatprep.subr.bf16.mxu1 %v5425_v49 }
 0x2dc   : > { %1572 = vmatpush1.bf16.msra.mxu1 %v6156_v54 }
 0x2dd   : > { %1573 = vmatprep.subr.bf16.mxu1 %v5431_v45 }
 0x2e0   : > { %1574 = vmatpush1.bf16.msra.mxu1 %v5434_v42 }
 0x376   : > { %v1063_v56 = vpop.f32.mrb[4].mxu1 }
 0x377   : > { %v1064_v57 = vadd.f32 %v5565_v55, %v1063_v56  ;;  %v4427_v58 = vpop.f32.mrb[5].mxu1 }
 0x378   : > { %v1066_v59 = vpop.f32.mrb[6].mxu1 }
 0x379   : > { %4005 = vst [vmem:[%s5417_s14 + $0x10] sm:$0xff] %v1064_v57  ;;  %v1067_v60 = vadd.f32 %v5565_v55, %v1066_v59  ;;  %1073 = vmax.xlane.f32.xlu0 %v1064_v57  ;;  %v4428_v61 = vpop.f32.mrb[7].mxu1 }
 0x37b   : > { %4006 = vst [vmem:[%s5417_s14 + $0x18] sm:$0xff] %v1067_v60  ;;  %1075 = vmax.xlane.f32.xlu1 %v1067_v60 }
 0x406   : > { %v1074_v62 = vpop.xlane.xlu0 %1073 }
 0x407   : > { %vm1077_vm8 = vcmp.ge.f32.partialorder %v1064_v57, %v1074_v62 }
 0x408   : > { %v1079_v63 = vsel %vm1077_vm8, %v5317_v38, 128  ;;  %v1076_v0 = vpop.xlane.xlu1 %1075 }
 0x409   : > { %vm1078_vm9 = vcmp.ge.f32.partialorder %v1067_v60, %v1076_v0  ;;  %v1082_v1 = vshra.s32 %v1079_v63, 16  ;;  %v1081_v39 = vand.u32 65535, %v1079_v63 }
 0x40a   : > { %v1080_v2 = vsel %vm1078_vm9, %v5317_v38, 128 }
 0x40b   : > { %v1084_v3 = vcvt.s32.f32 %v1082_v1  ;;  %v1096_v4 = vshra.s32 %v1080_v2, 16  ;;  %v1095_v41 = vand.u32 65535, %v1080_v2  ;;  %v1083_v45 = vcvt.s32.f32 %v1081_v39 }
 0x40d   : > { %1085 = vmin.xlane.f32.xlu0 %v1084_v3  ;;  %v1098_v37 = vcvt.s32.f32 %v1096_v4  ;;  %v1097_v44 = vcvt.s32.f32 %v1095_v41 }
 0x411   : > { %1099 = vmin.xlane.f32.xlu0 %v1098_v37 }
 0x49a   : > { %v1086_v42 = vpop.xlane.xlu0 %1085 }
 0x49b   : > { %vm1087_vm10 = vcmp.eq.f32.partialorder %v1084_v3, %v1086_v42  ;;  %v1092_v23 = vcvt.f32.s32 %v1086_v42 }
 0x49c   : > { %v1088_v46 = vsel %vm1087_vm10, %v1083_v45, inf }
 0x49d   : > { %1089 = vmin.xlane.f32.xlu1 %v1088_v46  ;;  %v1093_v29 = vshll.u32 %v1092_v23, 16 }
 0x49e   : > { %v1100_v49 = vpop.xlane.xlu0 %1099 }
 0x49f   : > { %vm1101_vm11 = vcmp.eq.f32.partialorder %v1098_v37, %v1100_v49  ;;  %v1106_v27 = vcvt.f32.s32 %v1100_v49 }
 0x4a0   : > { %v1102_v17 = vsel %vm1101_vm11, %v1097_v44, inf }
 0x4a1   : > { %1103 = vmin.xlane.f32.xlu0 %v1102_v17  ;;  %v1107_v11 = vshll.u32 %v1106_v27, 16 }
 0x52a   : > { %v1090_v26 = vpop.xlane.xlu1 %1089 }
 0x52b   : > { %v1091_v28 = vcvt.f32.s32 %v1090_v26 }
 0x52d   : > { %v1094_v31 = vadd.s32 %v1093_v29, %v1091_v28 }
 0x52e   : > { %v1104_v30 = vpop.xlane.xlu0 %1103 }
 0x52f   : > { %v1105_v32 = vcvt.f32.s32 %v1104_v30  ;;  %vm1109_vm12 = vcmp.eq.s32.totalorder %v5317_v38, %v1094_v31 }
 0x531   : > { %v1108_v33 = vadd.s32 %v1107_v11, %v1105_v32 }
 0x533   : > { %vm1110_vm13 = vcmp.eq.s32.totalorder %v5317_v38, %v1108_v33 }
 0x534   : > { %vm4073_vm14 = vmpackc.low %vm1110_vm13, %vm1109_vm12 }
 0x535   : > { %4074 = vmatmul.mubr.msk.bf16.vlgmr.msra.gmra.mrb[8].mxu0 %vm4073_vm14, %v6120_v43  ;;  %4076 = vmatmul.mubr.msk.bf16.vlgmr.msra.gmra.mrb[8].mxu1 %vm4073_vm14, %v6120_v43  ;;  %v5801_v43 = vld [vmem:[#allocation2 + $0x1a8] ss:$16 sps:$4 sm:$0xff]  }
 0x536   : > { %4445 = vmatprep.mubr.msk.bf16.mxu0 %vm5083_vm7, %v6151_v6  ;;  %4430 = vmatpush3.bf16.msra.mxu0 %v4685_v34  ;;  %6170 = vst [vmem:[#allocation23_spill] sm:$0xff] %v5801_v43 }
 0x537   : > { %4431 = vmatprep.subr.bf16.mxu0 %v6151_v6 }
 0x53a   : > { %4432 = vmatpush3.bf16.msra.mxu0 %v4686_v36 }
 0x53b   : > { %4433 = vmatprep.subr.bf16.mxu0 %v6151_v6 }
 0x53e   : > { %4434 = vmatpush3.bf16.msra.mxu0 %v4687_v5  ;;  %v5638_v5 = vld [vmem:[#allocation2] ss:$16 sps:$4 sm:$0xff]  }
 0x53f   : > { %4435 = vmatprep.subr.bf16.mxu0 %v6151_v6 }
 0x542   : > { %4436 = vmatpush3.bf16.msra.mxu0 %v4688_v40  ;;  %v5640_v40 = vld [vmem:[#allocation2 + $0x4] ss:$16 sps:$4 sm:$0xff]  }
 0x543   : > { %4437 = vmatprep.subr.bf16.mxu0 %v6151_v6  ;;  %2176 = vmatprep.subr.bf16.mxu1 %v5640_v40 }
 0x544   : > { %2177 = vmatpush1.bf16.msra.mxu1 %v5638_v5 }
 0x546   : > { %4438 = vmatpush3.bf16.msra.mxu0 %v4689_v48  ;;  %v5642_v48 = vld [vmem:[#allocation2 + $0x8] ss:$16 sps:$4 sm:$0xff]  }
 0x547   : > { %4439 = vmatprep.subr.bf16.mxu0 %v6151_v6 }
 0x54a   : > { %4440 = vmatpush3.bf16.msra.mxu0 %v4690_v7  ;;  %v5644_v7 = vld [vmem:[#allocation2 + $0xc] ss:$16 sps:$4 sm:$0xff]  }
 0x54b   : > { %4441 = vmatprep.subr.bf16.mxu0 %v6151_v6 }
 0x54e   : > { %4442 = vmatpush3.bf16.msra.mxu0 %v4691_v8  ;;  %v5646_v8 = vld [vmem:[#allocation2 + $0x24] ss:$16 sps:$4 sm:$0xff]  }
 0x54f   : > { %4443 = vmatprep.subr.bf16.mxu0 %v6151_v6  ;;  %2178 = vmatprep.subr.bf16.mxu1 %v5646_v8 }
 0x552   : > { %4444 = vmatpush3.bf16.msra.mxu0 %v4692_v9  ;;  %v5649_v9 = vld [vmem:[#allocation2 + $0x2c] ss:$16 sps:$4 sm:$0xff]  }
 0x553   : > { %2219 = vmatprep.subr.bf16.mxu0 %v5644_v7 }
 0x608   : > { %v1534_v10 = vpop.f32.mrb[8].mxu0  ;;  %v1577_v12 = vpop.f32.mrb[8].mxu1 }
 0x609   : > { %v4077_v13 = vmul.f32 -1.442695, %v1534_v10  ;;  %v1536_v14 = vpop.f32.mrb[9].mxu0  ;;  %v1579_v15 = vpop.f32.mrb[9].mxu1  ;;  %v5653_v10 = vld [vmem:[#allocation2 + $0x20] ss:$16 sps:$4 sm:$0xff]  }
 0x60a   : > { %v1538_v16 = vpop.f32.mrb[10].mxu0  ;;  %v1581_v18 = vpop.f32.mrb[10].mxu1  ;;  %v4079_v22 = vmul.f32 -1.442695, %v1536_v14  ;;  %v1617_v58 = vadd.f32 %v5519_v35, %v1579_v15  ;;  %v5662_v14 = vld [vmem:[#allocation2 + $0x4c] ss:$16 sps:$4 sm:$0xff]   ;;  %2179 = vmatpush1.bf16.msra.mxu1 %v5653_v10 }
 0x60b   : > { %4929 = vpow2.f32 %v4077_v13  ;;  %v4078_v19 = vmul.f32 -1.442695, %v1538_v16  ;;  %v1540_v20 = vpop.f32.mrb[11].mxu0  ;;  %v1583_v21 = vpop.f32.mrb[11].mxu1  ;;  %v5659_v13 = vld [vmem:[#allocation2 + $0x44] ss:$16 sps:$4 sm:$0xff]  }
 0x60c   : > { %v4080_v47 = vmul.f32 -1.442695, %v1540_v20  ;;  %v1618_v62 = vadd.f32 %v5519_v35, %v1583_v21  ;;  %v5665_v15 = vld [vmem:[#allocation2 + $0x40] ss:$16 sps:$4 sm:$0xff]   ;;  %2180 = vmatprep.subr.bf16.mxu1 %v5659_v13  ;;  %v5669_v16 = vld [vmem:[#allocation2 + $0x48] ss:$16 sps:$4 sm:$0xff]  }
 0x60d   : > { %4931 = vpow2.f32 %v4078_v19  ;;  %v5674_v19 = vld [vmem:[#allocation2 + $0x6c] ss:$16 sps:$4 sm:$0xff]   ;;  %v5677_v20 = vld [vmem:[#allocation2 + $0x60] ss:$16 sps:$4 sm:$0xff]   ;;  %v5681_v21 = vld [vmem:[#allocation2 + $0x68] ss:$16 sps:$4 sm:$0xff]  }
 0x60e   : > { %4933 = vpow2.f32 %v4079_v22  ;;  %2181 = vmatpush1.bf16.msra.mxu1 %v5665_v15  ;;  %v5683_v22 = vld [vmem:[#allocation2 + $0x84] ss:$16 sps:$4 sm:$0xff]  }
 0x60f   : > { %4935 = vpow2.f32 %v4080_v47  ;;  %v5686_v47 = vld [vmem:[#allocation2 + $0x8c] ss:$16 sps:$4 sm:$0xff]  }
 0x615   : > { %v4930_v50 = vpop.eup %4929 }
 0x616   : > { %v1592_v51 = vadd.f32 1.0, %v4930_v50  ;;  %v5689_v50 = vld [vmem:[#allocation2 + $0x80] ss:$16 sps:$4 sm:$0xff]  }
 0x617   : > { %v4932_v52 = vpop.eup %4931 }
 0x618   : > { %4937 = vrcp.f32 %v1592_v51  ;;  %v1593_v53 = vadd.f32 1.0, %v4932_v52  ;;  %v4934_v54 = vpop.eup %4933  ;;  %v5693_v51 = vld [vmem:[#allocation2 + $0x88] ss:$16 sps:$4 sm:$0xff]   ;;  %v5695_v52 = vld [vmem:[#allocation2 + $0xa4] ss:$16 sps:$4 sm:$0xff]  }
 0x619   : > { %v4936_v56 = vpop.eup %4935  ;;  %v1604_v57 = vadd.f32 1.0, %v4934_v54  ;;  %v5701_v54 = vld [vmem:[#allocation2 + $0xa0] ss:$16 sps:$4 sm:$0xff]  }
 0x61a   : > { %4939 = vrcp.f32 %v1593_v53  ;;  %v1605_v59 = vadd.f32 1.0, %v4936_v56  ;;  %v5698_v53 = vld [vmem:[#allocation2 + $0xac] ss:$16 sps:$4 sm:$0xff]   ;;  %v5705_v56 = vld [vmem:[#allocation2 + $0xa8] ss:$16 sps:$4 sm:$0xff]  }
 0x61b   : > { %4941 = vrcp.f32 %v1604_v57  ;;  %v5707_v57 = vld [vmem:[#allocation2 + $0xc4] ss:$16 sps:$4 sm:$0xff]  }
 0x61c   : > { %4943 = vrcp.f32 %v1605_v59  ;;  %v5713_v59 = vld [vmem:[#allocation2 + $0xc0] ss:$16 sps:$4 sm:$0xff]  }
 0x622   : > { %v4938_v60 = vpop.eup %4937 }
 0x623   : > { %v1619_v61 = vmul.f32 %v4938_v60, %v1617_v58  ;;  %v5710_v58 = vld [vmem:[#allocation2 + $0xcc] ss:$16 sps:$4 sm:$0xff]   ;;  %v5717_v60 = vld [vmem:[#allocation2 + $0xc8] ss:$16 sps:$4 sm:$0xff]  }
 0x624   : > { %v4940_v63 = vpop.eup %4939 }
 0x625   : > { %v1621_v0 = vadd.f32 %v1619_v61, %v1577_v12  ;;  %v1620_v1 = vmul.f32 %v4940_v63, %v1618_v62  ;;  %v4942_v3 = vpop.eup %4941  ;;  %v5657_v12 = vld [vmem:[#allocation2 + $0x28] ss:$16 sps:$4 sm:$0xff]   ;;  %v5719_v61 = vld [vmem:[#allocation2 + $0xe4] ss:$16 sps:$4 sm:$0xff]   ;;  %v5722_v62 = vld [vmem:[#allocation2 + $0xec] ss:$16 sps:$4 sm:$0xff]  }
 0x626   : > { %v4944_v4 = vpop.eup %4943  ;;  %v1625_v37 = vsub.f32 1.0, %v4942_v3  ;;  %v1629_v45 = vmul.f32 %v4942_v3, %v5525_v24  ;;  %6157 = vst [vmem:[#allocation10_spill] sm:$0xff] %v5722_v62  ;;  %v5725_v63 = vld [vmem:[#allocation2 + $0xe0] ss:$16 sps:$4 sm:$0xff]  }
 0x627   : > { %4945 = vtanh.f32 %v1621_v0  ;;  %v1622_v2 = vadd.f32 %v1620_v1, %v1581_v18  ;;  %v1626_v41 = vsub.f32 1.0, %v4944_v4  ;;  %v1630_v35 = vmul.f32 %v4944_v4, %v5527_v25  ;;  %v5671_v18 = vld [vmem:[#allocation2 + $0x64] ss:$16 sps:$4 sm:$0xff]   ;;  %v5729_v0 = vld [vmem:[#allocation2 + $0xe8] ss:$16 sps:$4 sm:$0xff]  }
 0x628   : > { %2182 = vmatprep.subr.bf16.mxu1 %v5671_v18  ;;  %6158 = vst [vmem:[#allocation11_spill] sm:$0xff] %v5729_v0  ;;  %v5731_v1 = vld [vmem:[#allocation2 + $0x104] ss:$16 sps:$4 sm:$0xff]   ;;  %v5737_v3 = vld [vmem:[#allocation2 + $0x100] ss:$16 sps:$4 sm:$0xff]  }
 0x629   : > { %4947 = vtanh.f32 %v1622_v2  ;;  %2183 = vmatpush1.bf16.msra.mxu1 %v5677_v20  ;;  %v5734_v2 = vld [vmem:[#allocation2 + $0x10c] ss:$16 sps:$4 sm:$0xff]   ;;  %v5741_v4 = vld [vmem:[#allocation2 + $0x108] ss:$16 sps:$4 sm:$0xff]  }
 0x62a   : > { %2184 = vmatprep.subr.bf16.mxu1 %v5683_v22  ;;  %6159 = vst [vmem:[#allocation12_spill] sm:$0xff] %v5734_v2  ;;  %6160 = vst [vmem:[#allocation13_spill] sm:$0xff] %v5741_v4 }
 0x62d   : > { %2185 = vmatpush1.bf16.msra.mxu1 %v5689_v50 }
 0x62e   : > { %2186 = vmatprep.subr.bf16.mxu1 %v5695_v52 }
 0x631   : > { %v4946_v39 = vpop.eup %4945  ;;  %2187 = vmatpush1.bf16.msra.mxu1 %v5701_v54 }
 0x632   : > { %v1627_v42 = vmul.f32 %v4946_v39, %v1625_v37  ;;  %2188 = vmatprep.subr.bf16.mxu1 %v5707_v57  ;;  %v5743_v37 = vld [vmem:[#allocation2 + $0x124] ss:$16 sps:$4 sm:$0xff]   ;;  %v5746_v39 = vld [vmem:[#allocation2 + $0x12c] ss:$16 sps:$4 sm:$0xff]  }
 0x633   : > { %v4948_v46 = vpop.eup %4947  ;;  %6161 = vst [vmem:[#allocation14_spill] sm:$0xff] %v5746_v39 }
 0x634   : > { %v1628_v49 = vmul.f32 %v4948_v46, %v1626_v41  ;;  %v5614_v44 = vadd.f32 %v1629_v45, %v1627_v42  ;;  %v5749_v41 = vld [vmem:[#allocation2 + $0x120] ss:$16 sps:$4 sm:$0xff]   ;;  %v5753_v42 = vld [vmem:[#allocation2 + $0x128] ss:$16 sps:$4 sm:$0xff]   ;;  %v5755_v45 = vld [vmem:[#allocation2 + $0x144] ss:$16 sps:$4 sm:$0xff]  }
 0x635   : > { %2189 = vmatpush1.bf16.msra.mxu1 %v5713_v59  ;;  %6162 = vst [vmem:[#allocation15_spill] sm:$0xff] %v5753_v42  ;;  %v5758_v46 = vld [vmem:[#allocation2 + $0x14c] ss:$16 sps:$4 sm:$0xff]  }
 0x636   : > { %v5616_v17 = vadd.f32 %v1630_v35, %v1628_v49  ;;  %2190 = vmatprep.subr.bf16.mxu1 %v5719_v61  ;;  %6163 = vst [vmem:[#allocation16_spill] sm:$0xff] %v5758_v46  ;;  %v5761_v49 = vld [vmem:[#allocation2 + $0x140] ss:$16 sps:$4 sm:$0xff]   ;;  %v5765_v35 = vld [vmem:[#allocation2 + $0x148] ss:$16 sps:$4 sm:$0xff]  }
 0x637   : > { %6164 = vst [vmem:[#allocation17_spill] sm:$0xff] %v5765_v35 }
 0x638   : > { %v1633_v23 = vpack.c.bf16 %v5616_v17, %v5614_v44 }
 0x639   : > { %2191 = vmatpush1.bf16.msra.mxu1 %v5725_v63 }
 0x63a   : > { %4446 = vmatmul.mubr.bf16.vlgmr.msra.gmra.mrb[12].mxu0 %v1633_v23  ;;  %2208 = vmatprep.mubr.bf16.mxu1 %v1633_v23 }
 0x63b   : > { %2251 = vmatprep.mubr.bf16.mxu0 %v1633_v23  ;;  %2220 = vmatpush1.bf16.msra.mxu0 %v5642_v48  ;;  %v5767_v23 = vld [vmem:[#allocation2 + $0x164] ss:$16 sps:$4 sm:$0xff]  }
 0x63c   : > { %2221 = vmatprep.subr.bf16.mxu0 %v5649_v9  ;;  %2192 = vmatprep.subr.bf16.mxu1 %v5731_v1 }
 0x63d   : > { %2193 = vmatpush1.bf16.msra.mxu1 %v5737_v3 }
 0x63e   : > { %2194 = vmatprep.subr.bf16.mxu1 %v5743_v37 }
 0x63f   : > { %2222 = vmatpush1.bf16.msra.mxu0 %v5657_v12 }
 0x640   : > { %2223 = vmatprep.subr.bf16.mxu0 %v5662_v14 }
 0x641   : > { %2195 = vmatpush1.bf16.msra.mxu1 %v5749_v41 }
 0x642   : > { %2196 = vmatprep.subr.bf16.mxu1 %v5755_v45 }
 0x643   : > { %2224 = vmatpush1.bf16.msra.mxu0 %v5669_v16 }
 0x644   : > { %2225 = vmatprep.subr.bf16.mxu0 %v5674_v19 }
 0x645   : > { %2197 = vmatpush1.bf16.msra.mxu1 %v5761_v49 }
 0x646   : > { %2198 = vmatprep.subr.bf16.mxu1 %v5767_v23 }
 0x647   : > { %2226 = vmatpush1.bf16.msra.mxu0 %v5681_v21 }
 0x648   : > { %2227 = vmatprep.subr.bf16.mxu0 %v5686_v47 }
 0x64b   : > { %2228 = vmatpush1.bf16.msra.mxu0 %v5693_v51 }
 0x64c   : > { %2229 = vmatprep.subr.bf16.mxu0 %v5698_v53 }
 0x64f   : > { %2230 = vmatpush1.bf16.msra.mxu0 %v5705_v56 }
 0x650   : > { %2231 = vmatprep.subr.bf16.mxu0 %v5710_v58 }
 0x653   : > { %2232 = vmatpush1.bf16.msra.mxu0 %v5717_v60 }
 0x654   : > { %2233 = vmatprep.subr.bf16.mxu0 %v5722_v62 }
 0x657   : > { %2234 = vmatpush1.bf16.msra.mxu0 %v5729_v0 }
 0x658   : > { %2235 = vmatprep.subr.bf16.mxu0 %v5734_v2  ;;  %v5812_v2 = vld [vmem:[#allocation2 + $0x1c8] ss:$16 sps:$4 sm:$0xff]  }
 0x659   : > { %6172 = vst [vmem:[#allocation25_spill] sm:$0xff] %v5812_v2 }
 0x65b   : > { %2236 = vmatpush1.bf16.msra.mxu0 %v5741_v4  ;;  %v5810_v4 = vld [vmem:[#allocation2 + $0x1cc] ss:$16 sps:$4 sm:$0xff]  }
 0x65c   : > { %2237 = vmatprep.subr.bf16.mxu0 %v5746_v39  ;;  %6171 = vst [vmem:[#allocation24_spill] sm:$0xff] %v5810_v4 }
 0x65f   : > { %2238 = vmatpush1.bf16.msra.mxu0 %v5753_v42 }
 0x660   : > { %2239 = vmatprep.subr.bf16.mxu0 %v5758_v46 }
 0x663   : > { %2240 = vmatpush1.bf16.msra.mxu0 %v5765_v35 }
 0x70d   : > { %v1739_v26 = vpop.f32.mrb[12].mxu0 }
 0x70e   : > { %v1740_v27 = vadd.f32 %v5565_v55, %v1739_v26  ;;  %v4447_v28 = vpop.f32.mrb[13].mxu0  ;;  %v5770_v26 = vld [vmem:[#allocation2 + $0x16c] ss:$16 sps:$4 sm:$0xff]  }
 0x70f   : > { %v1742_v24 = vpop.f32.mrb[14].mxu0  ;;  %6165 = vst [vmem:[#allocation18_spill] sm:$0xff] %v5770_v26  ;;  %v5777_v28 = vld [vmem:[#allocation2 + $0x168] ss:$16 sps:$4 sm:$0xff]   ;;  %2241 = vmatprep.subr.bf16.mxu0 %v5770_v26 }
 0x710   : > { %4091 = vst [vmem:[%s5417_s14 + $0x20] sm:$0xff] %v1740_v27  ;;  %v1743_v29 = vadd.f32 %v5565_v55, %v1742_v24  ;;  %1749 = vmax.xlane.f32.xlu1 %v1740_v27  ;;  %v4448_v25 = vpop.f32.mrb[15].mxu0  ;;  %6166 = vst [vmem:[#allocation19_spill] sm:$0xff] %v5777_v28  ;;  %v5779_v24 = vld [vmem:[#allocation2 + $0x184] ss:$16 sps:$4 sm:$0xff]   ;;  %2242 = vmatpush1.bf16.msra.mxu0 %v5777_v28 }
 0x711   : > { %v5785_v25 = vld [vmem:[#allocation2 + $0x180] ss:$16 sps:$4 sm:$0xff]  }
 0x712   : > { %4092 = vst [vmem:[%s5417_s14 + $0x28] sm:$0xff] %v1743_v29  ;;  %1751 = vmax.xlane.f32.xlu0 %v1743_v29 }
 0x79d   : > { %v1750_v30 = vpop.xlane.xlu1 %1749 }
 0x79e   : > { %vm1753_vm15 = vcmp.ge.f32.partialorder %v1740_v27, %v1750_v30  ;;  %v5773_v27 = vld [vmem:[#allocation2 + $0x160] ss:$16 sps:$4 sm:$0xff]   ;;  %v5789_v30 = vld [vmem:[#allocation2 + $0x188] ss:$16 sps:$4 sm:$0xff]  }
 0x79f   : > { %v5625_v11 = vsel %vm1753_vm15, %v5317_v38, 128  ;;  %v1752_v31 = vpop.xlane.xlu0 %1751  ;;  %2199 = vmatpush1.bf16.msra.mxu1 %v5773_v27  ;;  %6168 = vst [vmem:[#allocation21_spill] sm:$0xff] %v5789_v30 }
 0x7a0   : > { %vm1754_vm0 = vcmp.ge.f32.partialorder %v1743_v29, %v1752_v31  ;;  %v1758_v32 = vshra.s32 %v5625_v11, 16  ;;  %v5782_v29 = vld [vmem:[#allocation2 + $0x18c] ss:$16 sps:$4 sm:$0xff]   ;;  %2200 = vmatprep.subr.bf16.mxu1 %v5779_v24  ;;  %v5791_v31 = vld [vmem:[#allocation2 + $0x1a4] ss:$16 sps:$4 sm:$0xff]  }
 0x7a1   : > { %v5629_v33 = vsel %vm1754_vm0, %v5317_v38, 128  ;;  %6167 = vst [vmem:[#allocation20_spill] sm:$0xff] %v5782_v29  ;;  %2243 = vmatprep.subr.bf16.mxu0 %v5782_v29  ;;  %v1757_v29 = vand.u32 65535, %v5625_v11  ;;  %v4785_v11 = vld [vmem:[#allocation2 + $0x1e4] ss:$16 sps:$4 sm:$0xff]  }
 0x7a2   : > { %v5631_v34 = vcvt.s32.f32 %v1758_v32  ;;  %v1772_v55 = vshra.s32 %v5629_v33, 16  ;;  %v5794_v32 = vld [vmem:[#allocation2 + $0x1ac] ss:$16 sps:$4 sm:$0xff]   ;;  %2244 = vmatpush1.bf16.msra.mxu0 %v5789_v30  ;;  %v1771_v28 = vand.u32 65535, %v5629_v33 }
 0x7a3   : > { %6169 = vst [vmem:[#allocation22_spill] sm:$0xff] %v5794_v32  ;;  %2201 = vmatpush1.bf16.msra.mxu1 %v5785_v25  ;;  %2245 = vmatprep.subr.bf16.mxu0 %v5794_v32  ;;  %v1759_v35 = vcvt.s32.f32 %v1757_v29  ;;  %v4779_v32 = vld [vmem:[#allocation2 + $0x1c4] ss:$16 sps:$4 sm:$0xff]   ;;  %v5816_v33 = vld [vmem:[#allocation2 + $0x1ec] ss:$16 sps:$4 sm:$0xff]  }
 0x7a4   : > { %1761 = vmin.xlane.f32.xlu1 %v5631_v34  ;;  %v5635_v36 = vcvt.s32.f32 %v1772_v55  ;;  %v5797_v55 = vld [vmem:[#allocation2 + $0x1a0] ss:$16 sps:$4 sm:$0xff]   ;;  %2202 = vmatprep.subr.bf16.mxu1 %v5791_v31  ;;  %v1773_v42 = vcvt.s32.f32 %v1771_v28 }
 0x7a6   : > { %1775 = vmin.xlane.f32.xlu0 %v5635_v36  ;;  %2246 = vmatpush1.bf16.msra.mxu0 %v5801_v43  ;;  %v4777_v43 = vld [vmem:[#allocation2 + $0x1c0] ss:$16 sps:$4 sm:$0xff]  }
 0x7a7   : > { %2203 = vmatpush1.bf16.msra.mxu1 %v5797_v55  ;;  %2247 = vmatprep.subr.bf16.mxu0 %v5810_v4 }
 0x7a8   : > { %2204 = vmatprep.subr.bf16.mxu1 %v4779_v32 }
 0x7aa   : > { %2248 = vmatpush1.bf16.msra.mxu0 %v5812_v2 }
 0x7ab   : > { %2205 = vmatpush1.bf16.msra.mxu1 %v4777_v43  ;;  %2249 = vmatprep.subr.bf16.mxu0 %v5816_v33 }
 0x7ac   : > { %2206 = vmatprep.subr.bf16.mxu1 %v4785_v11 }
 0x831   : > { %v1762_v26 = vpop.xlane.xlu1 %1761 }
 0x832   : > { %vm1763_vm1 = vcmp.eq.f32.partialorder %v5631_v34, %v1762_v26  ;;  %v4783_v34 = vld [vmem:[#allocation2 + $0x1e0] ss:$16 sps:$4 sm:$0xff]  }
 0x833   : > { %v1776_v46 = vpop.xlane.xlu0 %1775  ;;  %v1764_v30 = vsel %vm1763_vm1, %v1759_v35, inf  ;;  %v5818_v35 = vld [vmem:[#allocation2 + $0x1e8] ss:$16 sps:$4 sm:$0xff]   ;;  %2207 = vmatpush1.bf16.msra.mxu1 %v4783_v34 }
 0x834   : > { %1765 = vmin.xlane.f32.xlu1 %v1764_v30  ;;  %vm1777_vm2 = vcmp.eq.f32.partialorder %v5635_v36, %v1776_v46  ;;  %6173 = vst [vmem:[#allocation26_spill] sm:$0xff] %v5818_v35  ;;  %2250 = vmatpush1.bf16.msra.mxu0 %v5818_v35  ;;  %v1768_v36 = vcvt.f32.s32 %v1762_v26  ;;  %v6174_v35 = vmov 1.0|1.0  }
 0x835   : > { %v1778_v39 = vsel %vm1777_vm2, %v1773_v42, inf  ;;  %4449 = vmatprep.subr.bf16.mxu1 %v6151_v6  ;;  %2852 = vmatprep.subr.bf16.mxu0 %v5640_v40  ;;  %v4790_v40 = vld [vmem:[%s6107_s5 + $0x8] sm:$0xff]  }
 0x836   : > { %1779 = vmin.xlane.f32.xlu0 %v1778_v39  ;;  %v1782_v39 = vcvt.f32.s32 %v1776_v46  ;;  %v1769_v28 = vshll.u32 %v1768_v36, 16 }
 0x838   : > { %v1783_v2 = vshll.u32 %v1782_v39, 16 }
 0x8c1   : > { %v1766_v42 = vpop.xlane.xlu1 %1765 }
 0x8c2   : > { %v1767_v29 = vcvt.f32.s32 %v1766_v42 }
 0x8c3   : > { %v1780_v30 = vpop.xlane.xlu0 %1779 }
 0x8c4   : > { %v1770_v4 = vadd.s32 %v1769_v28, %v1767_v29  ;;  %v1781_v0 = vcvt.f32.s32 %v1780_v30 }
 0x8c6   : > { %v1784_v62 = vadd.s32 %v1783_v2, %v1781_v0  ;;  %vm1785_vm3 = vcmp.eq.s32.totalorder %v5317_v38, %v1770_v4 }
 0x8c8   : > { %vm1786_vm4 = vcmp.eq.s32.totalorder %v5317_v38, %v1784_v62 }
 0x8c9   : > { %vm4159_vm5 = vmpackc.low %vm1786_vm4, %vm1785_vm3 }
 0x8ca   : > { %4160 = vmatmul.mubr.msk.bf16.vlgmr.msra.gmra.mrb[12].mxu1 %vm4159_vm5, %v6174_v35  ;;  %4162 = vmatmul.mubr.msk.bf16.vlgmr.msra.gmra.mrb[16].mxu0 %vm4159_vm5, %v6174_v35 }
 0x8cb   : > { %4465 = vmatprep.mubr.msk.bf16.mxu1 %vm5083_vm7, %v6151_v6  ;;  %2853 = vmatpush1.bf16.msra.mxu0 %v5638_v5  ;;  %v4789_v5 = vld [vmem:[%s6107_s5] sm:$0xff]  }
 0x8cc   : > { %2854 = vmatprep.subr.bf16.mxu0 %v5646_v8  ;;  %4450 = vmatpush3.bf16.msra.mxu1 %v4789_v5  ;;  %v4792_v8 = vld [vmem:[%s6107_s5 + $0x18] sm:$0xff]  }
 0x8cd   : > { %4451 = vmatprep.subr.bf16.mxu1 %v6151_v6 }
 0x8cf   : > { %2855 = vmatpush1.bf16.msra.mxu0 %v5653_v10  ;;  %v4793_v10 = vld [vmem:[%s6107_s5 + $0x20] sm:$0xff]  }
 0x8d0   : > { %2856 = vmatprep.subr.bf16.mxu0 %v5659_v13  ;;  %4452 = vmatpush3.bf16.msra.mxu1 %v4790_v40  ;;  %v4794_v13 = vld [vmem:[%s6107_s5 + $0x28] sm:$0xff]  }
 0x8d1   : > { %4453 = vmatprep.subr.bf16.mxu1 %v6151_v6 }
 0x8d3   : > { %2857 = vmatpush1.bf16.msra.mxu0 %v5665_v15  ;;  %v4795_v15 = vld [vmem:[%s6107_s5 + $0x30] sm:$0xff]  }
 0x8d4   : > { %2858 = vmatprep.subr.bf16.mxu0 %v5671_v18  ;;  %v4796_v18 = vld [vmem:[%s6107_s5 + $0x38] sm:$0xff]  }
 0x8d7   : > { %2859 = vmatpush1.bf16.msra.mxu0 %v5677_v20 }
 0x8d8   : > { %2860 = vmatprep.subr.bf16.mxu0 %v5683_v22 }
 0x8db   : > { %2861 = vmatpush1.bf16.msra.mxu0 %v5689_v50 }
 0x8dc   : > { %2862 = vmatprep.subr.bf16.mxu0 %v5695_v52 }
 0x8df   : > { %2863 = vmatpush1.bf16.msra.mxu0 %v5701_v54 }
 0x8e0   : > { %2864 = vmatprep.subr.bf16.mxu0 %v5707_v57 }
 0x8e3   : > { %2865 = vmatpush1.bf16.msra.mxu0 %v5713_v59 }
 0x8e4   : > { %2866 = vmatprep.subr.bf16.mxu0 %v5719_v61 }
 0x8e7   : > { %2867 = vmatpush1.bf16.msra.mxu0 %v5725_v63 }
 0x8e8   : > { %2868 = vmatprep.subr.bf16.mxu0 %v5731_v1 }
 0x8eb   : > { %2869 = vmatpush1.bf16.msra.mxu0 %v5737_v3 }
 0x8ec   : > { %2870 = vmatprep.subr.bf16.mxu0 %v5743_v37 }
 0x8ef   : > { %2871 = vmatpush1.bf16.msra.mxu0 %v5749_v41 }
 0x8f0   : > { %2872 = vmatprep.subr.bf16.mxu0 %v5755_v45  ;;  %v5893_v45 = vld [vmem:[%s6106_s4] ss:$0 sm:$0xff] }
 0x8f3   : > { %2873 = vmatpush1.bf16.msra.mxu0 %v5761_v49 }
 0x8f4   : > { %2874 = vmatprep.subr.bf16.mxu0 %v5767_v23 }
 0x8f7   : > { %2875 = vmatpush1.bf16.msra.mxu0 %v5773_v27 }
 0x8f8   : > { %2876 = vmatprep.subr.bf16.mxu0 %v5779_v24 }
 0x8fb   : > { %2877 = vmatpush1.bf16.msra.mxu0 %v5785_v25 }
 0x8fc   : > { %2878 = vmatprep.subr.bf16.mxu0 %v5791_v31 }
 0x8ff   : > { %2879 = vmatpush1.bf16.msra.mxu0 %v5797_v55 }
 0x900   : > { %2880 = vmatprep.subr.bf16.mxu0 %v4779_v32 }
 0x903   : > { %2881 = vmatpush1.bf16.msra.mxu0 %v4777_v43  ;;  %v4791_v43 = vld [vmem:[%s6107_s5 + $0x10] sm:$0xff]  }
 0x904   : > { %2882 = vmatprep.subr.bf16.mxu0 %v4785_v11  ;;  %4454 = vmatpush3.bf16.msra.mxu1 %v4791_v43 }
 0x905   : > { %4455 = vmatprep.subr.bf16.mxu1 %v6151_v6 }
 0x907   : > { %2883 = vmatpush1.bf16.msra.mxu0 %v4783_v34 }
 0x908   : > { %4469 = vmatprep.subr.bf16.mxu0 %v6151_v6  ;;  %4456 = vmatpush3.bf16.msra.mxu1 %v4792_v8 }
 0x909   : > { %4457 = vmatprep.subr.bf16.mxu1 %v6151_v6 }
 0x90c   : > { %4458 = vmatpush3.bf16.msra.mxu1 %v4793_v10 }
 0x90d   : > { %4459 = vmatprep.subr.bf16.mxu1 %v6151_v6 }
 0x910   : > { %4460 = vmatpush3.bf16.msra.mxu1 %v4794_v13  ;;  %v6190_v13 = vld [vmem:[#allocation25_spill] sm:$0xff] }
 0x911   : > { %4461 = vmatprep.subr.bf16.mxu1 %v6151_v6 }
 0x914   : > { %4462 = vmatpush3.bf16.msra.mxu1 %v4795_v15  ;;  %v6191_v15 = vld [vmem:[#allocation26_spill] sm:$0xff] }
 0x915   : > { %4463 = vmatprep.subr.bf16.mxu1 %v6151_v6 }
 0x918   : > { %4464 = vmatpush3.bf16.msra.mxu1 %v4796_v18  ;;  %v5939_v18 = vld [vmem:[%s6108_s6] ss:$0 sm:$0xff] }
 0x919   : > { %2895 = vmatprep.subr.bf16.mxu1 %v5644_v7 }
 0x99d   : > { %v2210_v20 = vpop.f32.mrb[12].mxu1  ;;  %v2253_v22 = vpop.f32.mrb[16].mxu0 }
 0x99e   : > { %v4163_v50 = vmul.f32 -1.442695, %v2210_v20  ;;  %v2212_v52 = vpop.f32.mrb[13].mxu1  ;;  %v2255_v54 = vpop.f32.mrb[17].mxu0 }
 0x99f   : > { %v2214_v57 = vpop.f32.mrb[14].mxu1  ;;  %v2257_v59 = vpop.f32.mrb[18].mxu0  ;;  %v4165_v0 = vmul.f32 -1.442695, %v2212_v52  ;;  %v2293_v49 = vadd.f32 %v5893_v45, %v2255_v54 }
 0x9a0   : > { %4949 = vpow2.f32 %v4163_v50  ;;  %v4164_v61 = vmul.f32 -1.442695, %v2214_v57  ;;  %v2216_v62 = vpop.f32.mrb[15].mxu1  ;;  %v2259_v63 = vpop.f32.mrb[19].mxu0 }
 0x9a1   : > { %v4166_v1 = vmul.f32 -1.442695, %v2216_v62  ;;  %v2294_v24 = vadd.f32 %v5893_v45, %v2259_v63 }
 0x9a2   : > { %4951 = vpow2.f32 %v4164_v61 }
 0x9a3   : > { %4953 = vpow2.f32 %v4165_v0 }
 0x9a4   : > { %4955 = vpow2.f32 %v4166_v1 }
 0x9aa   : > { %v4950_v2 = vpop.eup %4949 }
 0x9ab   : > { %v2268_v3 = vadd.f32 1.0, %v4950_v2 }
 0x9ac   : > { %v4952_v4 = vpop.eup %4951 }
 0x9ad   : > { %4957 = vrcp.f32 %v2268_v3  ;;  %v2269_v7 = vadd.f32 1.0, %v4952_v4  ;;  %v4954_v37 = vpop.eup %4953 }
 0x9ae   : > { %v4956_v41 = vpop.eup %4955  ;;  %v2280_v46 = vadd.f32 1.0, %v4954_v37 }
 0x9af   : > { %4959 = vrcp.f32 %v2269_v7  ;;  %v2281_v23 = vadd.f32 1.0, %v4956_v41 }
 0x9b0   : > { %4961 = vrcp.f32 %v2280_v46 }
 0x9b1   : > { %4963 = vrcp.f32 %v2281_v23 }
 0x9b7   : > { %v4958_v26 = vpop.eup %4957 }
 0x9b8   : > { %v2295_v27 = vmul.f32 %v4958_v26, %v2293_v49 }
 0x9b9   : > { %v4960_v25 = vpop.eup %4959 }
 0x9ba   : > { %v2297_v31 = vadd.f32 %v2295_v27, %v2253_v22  ;;  %v2296_v32 = vmul.f32 %v4960_v25, %v2294_v24  ;;  %v4962_v11 = vpop.eup %4961 }
 0x9bb   : > { %v4964_v34 = vpop.eup %4963  ;;  %v2301_v36 = vsub.f32 1.0, %v4962_v11  ;;  %v2305_v29 = vmul.f32 %v4962_v11, %v5614_v44  ;;  %v6175_v44 = vld [vmem:[#allocation10_spill] sm:$0xff] }
 0x9bc   : > { %4965 = vtanh.f32 %v2297_v31  ;;  %v2298_v55 = vadd.f32 %v2296_v32, %v2257_v59  ;;  %v2302_v42 = vsub.f32 1.0, %v4964_v34  ;;  %v2306_v40 = vmul.f32 %v4964_v34, %v5616_v17  ;;  %v6176_v17 = vld [vmem:[#allocation11_spill] sm:$0xff] }
 0x9be   : > { %4967 = vtanh.f32 %v2298_v55 }
 0x9c6   : > { %v4966_v39 = vpop.eup %4965 }
 0x9c7   : > { %v2303_v28 = vmul.f32 %v4966_v39, %v2301_v36  ;;  %v4797_v39 = vld [vmem:[%s6107_s5] sm:$0xff]  }
 0x9c8   : > { %v4968_v30 = vpop.eup %4967 }
 0x9c9   : > { %v2304_v5 = vmul.f32 %v4968_v30, %v2302_v42  ;;  %v5899_v43 = vadd.f32 %v2305_v29, %v2303_v28  ;;  %v4798_v42 = vld [vmem:[%s6107_s5 + $0x8] sm:$0xff]   ;;  %v4799_v28 = vld [vmem:[%s6107_s5 + $0x10] sm:$0xff]   ;;  %v4800_v29 = vld [vmem:[%s6107_s5 + $0x18] sm:$0xff]  }
 0x9ca   : > { %v4801_v30 = vld [vmem:[%s6107_s5 + $0x20] sm:$0xff]  }
 0x9cb   : > { %v5901_v8 = vadd.f32 %v2306_v40, %v2304_v5  ;;  %v4802_v5 = vld [vmem:[%s6107_s5 + $0x28] sm:$0xff]   ;;  %v4803_v40 = vld [vmem:[%s6107_s5 + $0x30] sm:$0xff]  }
 0x9cd   : > { %v2309_v10 = vpack.c.bf16 %v5901_v8, %v5899_v43 }
 0x9cf   : > { %4466 = vmatmul.mubr.bf16.vlgmr.msra.gmra.mrb[16].mxu1 %v2309_v10  ;;  %2884 = vmatprep.mubr.bf16.mxu0 %v2309_v10 }
 0x9d0   : > { %2927 = vmatprep.mubr.bf16.mxu1 %v2309_v10  ;;  %2896 = vmatpush1.bf16.msra.mxu1 %v5642_v48  ;;  %v6177_v48 = vld [vmem:[#allocation12_spill] sm:$0xff]  ;;  %v4804_v10 = vld [vmem:[%s6107_s5 + $0x38] sm:$0xff]  }
 0x9d1   : > { %2897 = vmatprep.subr.bf16.mxu1 %v5649_v9  ;;  %v6178_v9 = vld [vmem:[#allocation13_spill] sm:$0xff] }
 0x9d4   : > { %2898 = vmatpush1.bf16.msra.mxu1 %v5657_v12  ;;  %v6179_v12 = vld [vmem:[#allocation14_spill] sm:$0xff] }
 0x9d5   : > { %2899 = vmatprep.subr.bf16.mxu1 %v5662_v14  ;;  %v6180_v14 = vld [vmem:[#allocation15_spill] sm:$0xff] }
 0x9d8   : > { %2900 = vmatpush1.bf16.msra.mxu1 %v5669_v16  ;;  %v6181_v16 = vld [vmem:[#allocation16_spill] sm:$0xff] }
 0x9d9   : > { %2901 = vmatprep.subr.bf16.mxu1 %v5674_v19  ;;  %v6182_v19 = vld [vmem:[#allocation17_spill] sm:$0xff] }
 0x9dc   : > { %2902 = vmatpush1.bf16.msra.mxu1 %v5681_v21  ;;  %v6183_v21 = vld [vmem:[#allocation18_spill] sm:$0xff] }
 0x9dd   : > { %2903 = vmatprep.subr.bf16.mxu1 %v5686_v47  ;;  %v6184_v47 = vld [vmem:[#allocation19_spill] sm:$0xff] }
 0x9e0   : > { %2904 = vmatpush1.bf16.msra.mxu1 %v5693_v51  ;;  %v6185_v51 = vld [vmem:[#allocation20_spill] sm:$0xff] }
 0x9e1   : > { %2905 = vmatprep.subr.bf16.mxu1 %v5698_v53  ;;  %v6186_v53 = vld [vmem:[#allocation21_spill] sm:$0xff] }
 0x9e4   : > { %2906 = vmatpush1.bf16.msra.mxu1 %v5705_v56  ;;  %v6187_v56 = vld [vmem:[#allocation22_spill] sm:$0xff] }
 0x9e5   : > { %2907 = vmatprep.subr.bf16.mxu1 %v5710_v58  ;;  %v6188_v58 = vld [vmem:[#allocation23_spill] sm:$0xff] }
 0x9e8   : > { %2908 = vmatpush1.bf16.msra.mxu1 %v5717_v60  ;;  %v6189_v60 = vld [vmem:[#allocation24_spill] sm:$0xff] }
 0x9e9   : > { %2909 = vmatprep.subr.bf16.mxu1 %v6175_v44 }
 0x9ec   : > { %2910 = vmatpush1.bf16.msra.mxu1 %v6176_v17 }
 0x9ed   : > { %2911 = vmatprep.subr.bf16.mxu1 %v6177_v48 }
 0x9f0   : > { %2912 = vmatpush1.bf16.msra.mxu1 %v6178_v9 }
 0x9f1   : > { %2913 = vmatprep.subr.bf16.mxu1 %v6179_v12 }
 0x9f4   : > { %2914 = vmatpush1.bf16.msra.mxu1 %v6180_v14 }
 0x9f5   : > { %2915 = vmatprep.subr.bf16.mxu1 %v6181_v16 }
 0x9f8   : > { %2916 = vmatpush1.bf16.msra.mxu1 %v6182_v19 }
 0x9f9   : > { %2917 = vmatprep.subr.bf16.mxu1 %v6183_v21 }
 0x9fc   : > { %2918 = vmatpush1.bf16.msra.mxu1 %v6184_v47 }
 0x9fd   : > { %2919 = vmatprep.subr.bf16.mxu1 %v6185_v51 }
 0xa00   : > { %2920 = vmatpush1.bf16.msra.mxu1 %v6186_v53 }
 0xa01   : > { %2921 = vmatprep.subr.bf16.mxu1 %v6187_v56 }
 0xa04   : > { %2922 = vmatpush1.bf16.msra.mxu1 %v6188_v58 }
 0xa05   : > { %2923 = vmatprep.subr.bf16.mxu1 %v6189_v60 }
 0xa08   : > { %2924 = vmatpush1.bf16.msra.mxu1 %v6190_v13 }
 0xa09   : > { %2925 = vmatprep.subr.bf16.mxu1 %v5816_v33 }
 0xa0c   : > { %2926 = vmatpush1.bf16.msra.mxu1 %v6191_v15 }
 0xaa2   : > { %v2415_v20 = vpop.f32.mrb[16].mxu1 }
 0xaa3   : > { %v2416_v22 = vadd.f32 %v5939_v18, %v2415_v20  ;;  %v4467_v50 = vpop.f32.mrb[17].mxu1 }
 0xaa4   : > { %v2418_v52 = vpop.f32.mrb[18].mxu1 }
 0xaa5   : > { %4177 = vst [vmem:[%s5417_s14 + $0x30] sm:$0xff] %v2416_v22  ;;  %v2419_v54 = vadd.f32 %v5939_v18, %v2418_v52  ;;  %2425 = vmax.xlane.f32.xlu1 %v2416_v22  ;;  %v4468_v57 = vpop.f32.mrb[19].mxu1 }
 0xaa7   : > { %4178 = vst [vmem:[%s5417_s14 + $0x38] sm:$0xff] %v2419_v54  ;;  %2427 = vmax.xlane.f32.xlu0 %v2419_v54 }
 0xb32   : > { %v2426_v33 = vpop.xlane.xlu1 %2425 }
 0xb33   : > { %vm2429_vm6 = vcmp.ge.f32.partialorder %v2416_v22, %v2426_v33 }
 0xb34   : > { %v2431_v59 = vsel %vm2429_vm6, %v5317_v38, 128  ;;  %v2428_v61 = vpop.xlane.xlu0 %2427 }
 0xb35   : > { %vm2430_vm8 = vcmp.ge.f32.partialorder %v2419_v54, %v2428_v61  ;;  %v2434_v62 = vshra.s32 %v2431_v59, 16  ;;  %v2433_v3 = vand.u32 65535, %v2431_v59 }
 0xb36   : > { %v2432_v63 = vsel %vm2430_vm8, %v5317_v38, 128 }
 0xb37   : > { %v2436_v0 = vcvt.s32.f32 %v2434_v62  ;;  %v2448_v1 = vshra.s32 %v2432_v63, 16  ;;  %v2447_v4 = vand.u32 65535, %v2432_v63  ;;  %v2435_v37 = vcvt.s32.f32 %v2433_v3 }
 0xb39   : > { %2437 = vmin.xlane.f32.xlu1 %v2436_v0  ;;  %v2450_v2 = vcvt.s32.f32 %v2448_v1  ;;  %v2449_v49 = vcvt.s32.f32 %v2447_v4 }
 0xb3b   : > { %2451 = vmin.xlane.f32.xlu0 %v2450_v2 }
 0xbc6   : > { %v2438_v7 = vpop.xlane.xlu1 %2437 }
 0xbc7   : > { %vm2439_vm9 = vcmp.eq.f32.partialorder %v2436_v0, %v2438_v7  ;;  %v2444_v26 = vcvt.f32.s32 %v2438_v7 }
 0xbc8   : > { %v2452_v41 = vpop.xlane.xlu0 %2451  ;;  %v2440_v46 = vsel %vm2439_vm9, %v2435_v37, inf }
 0xbc9   : > { %2441 = vmin.xlane.f32.xlu1 %v2440_v46  ;;  %vm2453_vm10 = vcmp.eq.f32.partialorder %v2450_v2, %v2452_v41  ;;  %v2458_v27 = vcvt.f32.s32 %v2452_v41  ;;  %v2445_v25 = vshll.u32 %v2444_v26, 16 }
 0xbca   : > { %v2454_v23 = vsel %vm2453_vm10, %v2449_v49, inf }
 0xbcb   : > { %2455 = vmin.xlane.f32.xlu0 %v2454_v23  ;;  %v2459_v55 = vshll.u32 %v2458_v27, 16 }
 0xc56   : > { %v2442_v24 = vpop.xlane.xlu1 %2441 }
 0xc57   : > { %v2443_v31 = vcvt.f32.s32 %v2442_v24 }
 0xc58   : > { %v2456_v32 = vpop.xlane.xlu0 %2455 }
 0xc59   : > { %v2446_v11 = vadd.s32 %v2445_v25, %v2443_v31  ;;  %v2457_v34 = vcvt.f32.s32 %v2456_v32 }
 0xc5b   : > { %v2460_v36 = vadd.s32 %v2459_v55, %v2457_v34  ;;  %vm2461_vm11 = vcmp.eq.s32.totalorder %v5317_v38, %v2446_v11 }
 0xc5d   : > { %vm2462_vm12 = vcmp.eq.s32.totalorder %v5317_v38, %v2460_v36 }
 0xc5e   : > { %vm4245_vm13 = vmpackc.low %vm2462_vm12, %vm2461_vm11 }
 0xc5f   : > { %4246 = vmatmul.mubr.msk.bf16.vlgmr.msra.gmra.mrb[20].mxu0 %vm4245_vm13, %v6174_v35  ;;  %4248 = vmatmul.mubr.msk.bf16.vlgmr.msra.gmra.mrb[20].mxu1 %vm4245_vm13, %v6174_v35 }
 0xc60   : > { %4485 = vmatprep.mubr.msk.bf16.mxu0 %vm5083_vm7, %v6151_v6  ;;  %4470 = vmatpush3.bf16.msra.mxu0 %v4797_v39 }
 0xc61   : > { %4471 = vmatprep.subr.bf16.mxu0 %v6151_v6 }
 0xc64   : > { %4472 = vmatpush3.bf16.msra.mxu0 %v4798_v42 }
 0xc65   : > { %4473 = vmatprep.subr.bf16.mxu0 %v6151_v6 }
 0xc68   : > { %4474 = vmatpush3.bf16.msra.mxu0 %v4799_v28  ;;  %v4805_v28 = vld [vmem:[#allocation2] ss:$16 sps:$4 sm:$0xff]  }
 0xc69   : > { %4475 = vmatprep.subr.bf16.mxu0 %v6151_v6 }
 0xc6c   : > { %4476 = vmatpush3.bf16.msra.mxu0 %v4800_v29  ;;  %v4807_v29 = vld [vmem:[#allocation2 + $0x4] ss:$16 sps:$4 sm:$0xff]  }
 0xc6d   : > { %4477 = vmatprep.subr.bf16.mxu0 %v6151_v6  ;;  %3528 = vmatprep.subr.bf16.mxu1 %v4807_v29 }
 0xc6e   : > { %3529 = vmatpush1.bf16.msra.mxu1 %v4805_v28  ;;  %v4886_v28 = vld [vmem:[#allocation2 + $0x1a8] ss:$16 sps:$4 sm:$0xff]  }
 0xc70   : > { %4478 = vmatpush3.bf16.msra.mxu0 %v4801_v30  ;;  %v4808_v30 = vld [vmem:[#allocation2 + $0x8] ss:$16 sps:$4 sm:$0xff]  }
 0xc71   : > { %4479 = vmatprep.subr.bf16.mxu0 %v6151_v6 }
 0xc74   : > { %4480 = vmatpush3.bf16.msra.mxu0 %v4802_v5  ;;  %v4810_v5 = vld [vmem:[#allocation2 + $0xc] ss:$16 sps:$4 sm:$0xff]  }
 0xc75   : > { %4481 = vmatprep.subr.bf16.mxu0 %v6151_v6 }
 0xc78   : > { %4482 = vmatpush3.bf16.msra.mxu0 %v4803_v40  ;;  %v4813_v40 = vld [vmem:[#allocation2 + $0x24] ss:$16 sps:$4 sm:$0xff]  }
 0xc79   : > { %4483 = vmatprep.subr.bf16.mxu0 %v6151_v6  ;;  %3530 = vmatprep.subr.bf16.mxu1 %v4813_v40 }
 0xc7c   : > { %4484 = vmatpush3.bf16.msra.mxu0 %v4804_v10  ;;  %v4816_v10 = vld [vmem:[#allocation2 + $0x2c] ss:$16 sps:$4 sm:$0xff]  }
 0xc7d   : > { %3571 = vmatprep.subr.bf16.mxu0 %v4810_v5 }
 0xd32   : > { %v2886_v44 = vpop.f32.mrb[20].mxu0  ;;  %v2929_v17 = vpop.f32.mrb[20].mxu1 }
 0xd33   : > { %v4249_v48 = vmul.f32 -1.442695, %v2886_v44  ;;  %v2888_v9 = vpop.f32.mrb[21].mxu0  ;;  %v2931_v12 = vpop.f32.mrb[21].mxu1  ;;  %v4811_v44 = vld [vmem:[#allocation2 + $0x20] ss:$16 sps:$4 sm:$0xff]  }
 0xd34   : > { %v2890_v14 = vpop.f32.mrb[22].mxu0  ;;  %v2933_v16 = vpop.f32.mrb[22].mxu1  ;;  %v4251_v51 = vmul.f32 -1.442695, %v2888_v9  ;;  %v2969_v50 = vadd.f32 %v5893_v45, %v2931_v12  ;;  %v4822_v9 = vld [vmem:[#allocation2 + $0x4c] ss:$16 sps:$4 sm:$0xff]   ;;  %3531 = vmatpush1.bf16.msra.mxu1 %v4811_v44 }
 0xd35   : > { %4969 = vpow2.f32 %v4249_v48  ;;  %v4250_v19 = vmul.f32 -1.442695, %v2890_v14  ;;  %v2892_v21 = vpop.f32.mrb[23].mxu0  ;;  %v2935_v47 = vpop.f32.mrb[23].mxu1  ;;  %v4819_v48 = vld [vmem:[#allocation2 + $0x44] ss:$16 sps:$4 sm:$0xff]  }
 0xd36   : > { %v4252_v53 = vmul.f32 -1.442695, %v2892_v21  ;;  %v2970_v33 = vadd.f32 %v5893_v45, %v2935_v47  ;;  %v4817_v12 = vld [vmem:[#allocation2 + $0x40] ss:$16 sps:$4 sm:$0xff]   ;;  %3532 = vmatprep.subr.bf16.mxu1 %v4819_v48  ;;  %v4820_v14 = vld [vmem:[#allocation2 + $0x48] ss:$16 sps:$4 sm:$0xff]  }
 0xd37   : > { %4971 = vpow2.f32 %v4250_v19  ;;  %v4828_v19 = vld [vmem:[#allocation2 + $0x6c] ss:$16 sps:$4 sm:$0xff]   ;;  %v4823_v21 = vld [vmem:[#allocation2 + $0x60] ss:$16 sps:$4 sm:$0xff]   ;;  %v4826_v47 = vld [vmem:[#allocation2 + $0x68] ss:$16 sps:$4 sm:$0xff]  }
 0xd38   : > { %4973 = vpow2.f32 %v4251_v51  ;;  %3533 = vmatpush1.bf16.msra.mxu1 %v4817_v12  ;;  %v4831_v51 = vld [vmem:[#allocation2 + $0x84] ss:$16 sps:$4 sm:$0xff]   ;;  %v4894_v12 = vld [vmem:[#allocation2 + $0x1cc] ss:$16 sps:$4 sm:$0xff]  }
 0xd39   : > { %4975 = vpow2.f32 %v4252_v53  ;;  %v4834_v53 = vld [vmem:[#allocation2 + $0x8c] ss:$16 sps:$4 sm:$0xff]  }
 0xd3f   : > { %v4970_v56 = vpop.eup %4969 }
 0xd40   : > { %v2944_v58 = vadd.f32 1.0, %v4970_v56  ;;  %v4829_v56 = vld [vmem:[#allocation2 + $0x80] ss:$16 sps:$4 sm:$0xff]  }
 0xd41   : > { %v4972_v60 = vpop.eup %4971 }
 0xd42   : > { %4977 = vrcp.f32 %v2944_v58  ;;  %v2945_v13 = vadd.f32 1.0, %v4972_v60  ;;  %v4974_v15 = vpop.eup %4973  ;;  %v4832_v58 = vld [vmem:[#allocation2 + $0x88] ss:$16 sps:$4 sm:$0xff]   ;;  %v4837_v60 = vld [vmem:[#allocation2 + $0xa4] ss:$16 sps:$4 sm:$0xff]  }
 0xd43   : > { %v4976_v20 = vpop.eup %4975  ;;  %v2956_v22 = vadd.f32 1.0, %v4974_v15  ;;  %v4835_v15 = vld [vmem:[#allocation2 + $0xa0] ss:$16 sps:$4 sm:$0xff]  }
 0xd44   : > { %4979 = vrcp.f32 %v2945_v13  ;;  %v2957_v52 = vadd.f32 1.0, %v4976_v20  ;;  %v4840_v13 = vld [vmem:[#allocation2 + $0xac] ss:$16 sps:$4 sm:$0xff]   ;;  %v4838_v20 = vld [vmem:[#allocation2 + $0xa8] ss:$16 sps:$4 sm:$0xff]  }
 0xd45   : > { %4981 = vrcp.f32 %v2956_v22  ;;  %v4843_v22 = vld [vmem:[#allocation2 + $0xc4] ss:$16 sps:$4 sm:$0xff]  }
 0xd46   : > { %4983 = vrcp.f32 %v2957_v52  ;;  %v4841_v52 = vld [vmem:[#allocation2 + $0xc0] ss:$16 sps:$4 sm:$0xff]  }
 0xd4c   : > { %v4978_v54 = vpop.eup %4977 }
 0xd4d   : > { %v2971_v57 = vmul.f32 %v4978_v54, %v2969_v50  ;;  %v4846_v50 = vld [vmem:[#allocation2 + $0xcc] ss:$16 sps:$4 sm:$0xff]   ;;  %v4844_v54 = vld [vmem:[#allocation2 + $0xc8] ss:$16 sps:$4 sm:$0xff]  }
 0xd4e   : > { %v4980_v59 = vpop.eup %4979 }
 0xd4f   : > { %v2973_v61 = vadd.f32 %v2971_v57, %v2929_v17  ;;  %v2972_v62 = vmul.f32 %v4980_v59, %v2970_v33  ;;  %v4982_v0 = vpop.eup %4981  ;;  %v4814_v17 = vld [vmem:[#allocation2 + $0x28] ss:$16 sps:$4 sm:$0xff]   ;;  %v4849_v57 = vld [vmem:[#allocation2 + $0xe4] ss:$16 sps:$4 sm:$0xff]   ;;  %v4852_v33 = vld [vmem:[#allocation2 + $0xec] ss:$16 sps:$4 sm:$0xff]  }
 0xd50   : > { %v4984_v1 = vpop.eup %4983  ;;  %v2977_v2 = vsub.f32 1.0, %v4982_v0  ;;  %v2981_v37 = vmul.f32 %v4982_v0, %v5899_v43  ;;  %v4847_v59 = vld [vmem:[#allocation2 + $0xe0] ss:$16 sps:$4 sm:$0xff]  }
 0xd51   : > { %4985 = vtanh.f32 %v2973_v61  ;;  %v2974_v63 = vadd.f32 %v2972_v62, %v2933_v16  ;;  %v2978_v4 = vsub.f32 1.0, %v4984_v1  ;;  %v2982_v45 = vmul.f32 %v4984_v1, %v5901_v8  ;;  %v4825_v16 = vld [vmem:[#allocation2 + $0x64] ss:$16 sps:$4 sm:$0xff]   ;;  %v4850_v61 = vld [vmem:[#allocation2 + $0xe8] ss:$16 sps:$4 sm:$0xff]  }
 0xd52   : > { %3534 = vmatprep.subr.bf16.mxu1 %v4825_v16  ;;  %v4855_v62 = vld [vmem:[#allocation2 + $0x104] ss:$16 sps:$4 sm:$0xff]   ;;  %v4853_v0 = vld [vmem:[#allocation2 + $0x100] ss:$16 sps:$4 sm:$0xff]   ;;  %v4856_v1 = vld [vmem:[#allocation2 + $0x108] ss:$16 sps:$4 sm:$0xff]  }
 0xd53   : > { %4987 = vtanh.f32 %v2974_v63  ;;  %3535 = vmatpush1.bf16.msra.mxu1 %v4823_v21  ;;  %v4858_v63 = vld [vmem:[#allocation2 + $0x10c] ss:$16 sps:$4 sm:$0xff]   ;;  %v4892_v16 = vld [vmem:[#allocation2 + $0x1c8] ss:$16 sps:$4 sm:$0xff]  }
 0xd54   : > { %3536 = vmatprep.subr.bf16.mxu1 %v4831_v51 }
 0xd57   : > { %3537 = vmatpush1.bf16.msra.mxu1 %v4829_v56 }
 0xd58   : > { %3538 = vmatprep.subr.bf16.mxu1 %v4837_v60 }
 0xd5b   : > { %v4986_v3 = vpop.eup %4985  ;;  %3539 = vmatpush1.bf16.msra.mxu1 %v4835_v15 }
 0xd5c   : > { %v2979_v7 = vmul.f32 %v4986_v3, %v2977_v2  ;;  %3540 = vmatprep.subr.bf16.mxu1 %v4843_v22  ;;  %v4861_v2 = vld [vmem:[#allocation2 + $0x124] ss:$16 sps:$4 sm:$0xff]   ;;  %v4864_v3 = vld [vmem:[#allocation2 + $0x12c] ss:$16 sps:$4 sm:$0xff]  }
 0xd5d   : > { %v4988_v41 = vpop.eup %4987  ;;  %v4902_v22 = vld [vmem:[%s6107_s5 + $0x8] sm:$0xff]  }
 0xd5e   : > { %v2980_v46 = vmul.f32 %v4988_v41, %v2978_v4  ;;  %v5988_v49 = vadd.f32 %v2981_v37, %v2979_v7  ;;  %v4859_v4 = vld [vmem:[#allocation2 + $0x120] ss:$16 sps:$4 sm:$0xff]   ;;  %v4862_v7 = vld [vmem:[#allocation2 + $0x128] ss:$16 sps:$4 sm:$0xff]   ;;  %v4867_v37 = vld [vmem:[#allocation2 + $0x144] ss:$16 sps:$4 sm:$0xff]  }
 0xd5f   : > { %3541 = vmatpush1.bf16.msra.mxu1 %v4841_v52  ;;  %v4870_v41 = vld [vmem:[#allocation2 + $0x14c] ss:$16 sps:$4 sm:$0xff]  }
 0xd60   : > { %v5990_v23 = vadd.f32 %v2982_v45, %v2980_v46  ;;  %3542 = vmatprep.subr.bf16.mxu1 %v4849_v57  ;;  %v4865_v46 = vld [vmem:[#allocation2 + $0x140] ss:$16 sps:$4 sm:$0xff]   ;;  %v4868_v45 = vld [vmem:[#allocation2 + $0x148] ss:$16 sps:$4 sm:$0xff]  }
 0xd61   : > { %v4906_v52 = vld [vmem:[%s6107_s5 + $0x28] sm:$0xff]   ;;  %v4908_v57 = vld [vmem:[%s6107_s5 + $0x38] sm:$0xff]  }
 0xd62   : > { %v2985_v26 = vpack.c.bf16 %v5990_v23, %v5988_v49 }
 0xd63   : > { %3543 = vmatpush1.bf16.msra.mxu1 %v4847_v59 }
 0xd64   : > { %4486 = vmatmul.mubr.bf16.vlgmr.msra.gmra.mrb[24].mxu0 %v2985_v26  ;;  %3560 = vmatprep.mubr.bf16.mxu1 %v2985_v26 }
 0xd65   : > { %3603 = vmatprep.mubr.bf16.mxu0 %v2985_v26  ;;  %3572 = vmatpush1.bf16.msra.mxu0 %v4808_v30  ;;  %v4873_v26 = vld [vmem:[#allocation2 + $0x164] ss:$16 sps:$4 sm:$0xff]  }
 0xd66   : > { %3573 = vmatprep.subr.bf16.mxu0 %v4816_v10  ;;  %3544 = vmatprep.subr.bf16.mxu1 %v4855_v62 }
 0xd67   : > { %3545 = vmatpush1.bf16.msra.mxu1 %v4853_v0 }
 0xd68   : > { %3546 = vmatprep.subr.bf16.mxu1 %v4861_v2 }
 0xd69   : > { %3574 = vmatpush1.bf16.msra.mxu0 %v4814_v17 }
 0xd6a   : > { %3575 = vmatprep.subr.bf16.mxu0 %v4822_v9  ;;  %v4891_v9 = vld [vmem:[#allocation2 + $0x1c4] ss:$16 sps:$4 sm:$0xff]  }
 0xd6b   : > { %3547 = vmatpush1.bf16.msra.mxu1 %v4859_v4 }
 0xd6c   : > { %3548 = vmatprep.subr.bf16.mxu1 %v4867_v37 }
 0xd6d   : > { %3576 = vmatpush1.bf16.msra.mxu0 %v4820_v14  ;;  %v4889_v14 = vld [vmem:[#allocation2 + $0x1c0] ss:$16 sps:$4 sm:$0xff]  }
 0xd6e   : > { %3577 = vmatprep.subr.bf16.mxu0 %v4828_v19  ;;  %v4895_v19 = vld [vmem:[#allocation2 + $0x1e0] ss:$16 sps:$4 sm:$0xff]  }
 0xd6f   : > { %3549 = vmatpush1.bf16.msra.mxu1 %v4865_v46 }
 0xd70   : > { %3550 = vmatprep.subr.bf16.mxu1 %v4873_v26 }
 0xd71   : > { %3578 = vmatpush1.bf16.msra.mxu0 %v4826_v47 }
 0xd72   : > { %3579 = vmatprep.subr.bf16.mxu0 %v4834_v53 }
 0xd75   : > { %3580 = vmatpush1.bf16.msra.mxu0 %v4832_v58 }
 0xd76   : > { %3581 = vmatprep.subr.bf16.mxu0 %v4840_v13 }
 0xd79   : > { %3582 = vmatpush1.bf16.msra.mxu0 %v4838_v20  ;;  %v4901_v20 = vld [vmem:[%s6107_s5] sm:$0xff]  }
 0xd7a   : > { %3583 = vmatprep.subr.bf16.mxu0 %v4846_v50  ;;  %v4905_v50 = vld [vmem:[%s6107_s5 + $0x20] sm:$0xff]  }
 0xd7d   : > { %3584 = vmatpush1.bf16.msra.mxu0 %v4844_v54  ;;  %v4907_v54 = vld [vmem:[%s6107_s5 + $0x30] sm:$0xff]  }
 0xd7e   : > { %3585 = vmatprep.subr.bf16.mxu0 %v4852_v33 }
 0xd81   : > { %3586 = vmatpush1.bf16.msra.mxu0 %v4850_v61 }
 0xd82   : > { %3587 = vmatprep.subr.bf16.mxu0 %v4858_v63 }
 0xd85   : > { %3588 = vmatpush1.bf16.msra.mxu0 %v4856_v1 }
 0xd86   : > { %3589 = vmatprep.subr.bf16.mxu0 %v4864_v3 }
 0xd89   : > { %3590 = vmatpush1.bf16.msra.mxu0 %v4862_v7 }
 0xd8a   : > { %3591 = vmatprep.subr.bf16.mxu0 %v4870_v41 }
 0xd8d   : > { %3592 = vmatpush1.bf16.msra.mxu0 %v4868_v45 }
 0xe37   : > { %v3091_v27 = vpop.f32.mrb[24].mxu0 }
 0xe38   : > { %v3092_v24 = vadd.f32 %v5939_v18, %v3091_v27  ;;  %v4487_v25 = vpop.f32.mrb[25].mxu0  ;;  %v4876_v27 = vld [vmem:[#allocation2 + $0x16c] ss:$16 sps:$4 sm:$0xff]  }
 0xe39   : > { %v3094_v43 = vpop.f32.mrb[26].mxu0  ;;  %v4874_v25 = vld [vmem:[#allocation2 + $0x168] ss:$16 sps:$4 sm:$0xff]   ;;  %3593 = vmatprep.subr.bf16.mxu0 %v4876_v27 }
 0xe3a   : > { %4263 = vst [vmem:[%s5417_s14 + $0x40] sm:$0xff] %v3092_v24  ;;  %v3095_v31 = vadd.f32 %v5939_v18, %v3094_v43  ;;  %3101 = vmax.xlane.f32.xlu1 %v3092_v24  ;;  %v4488_v8 = vpop.f32.mrb[27].mxu0  ;;  %v4879_v43 = vld [vmem:[#allocation2 + $0x184] ss:$16 sps:$4 sm:$0xff]   ;;  %3594 = vmatpush1.bf16.msra.mxu0 %v4874_v25 }
 0xe3b   : > { %v4877_v8 = vld [vmem:[#allocation2 + $0x180] ss:$16 sps:$4 sm:$0xff]  }
 0xe3c   : > { %4264 = vst [vmem:[%s5417_s14 + $0x48] sm:$0xff] %v3095_v31  ;;  %3103 = vmax.xlane.f32.xlu0 %v3095_v31 }
 0xec7   : > { %v3102_v32 = vpop.xlane.xlu1 %3101 }
 0xec8   : > { %vm3105_vm14 = vcmp.ge.f32.partialorder %v3092_v24, %v3102_v32  ;;  %v4871_v24 = vld [vmem:[#allocation2 + $0x160] ss:$16 sps:$4 sm:$0xff]   ;;  %v4880_v32 = vld [vmem:[#allocation2 + $0x188] ss:$16 sps:$4 sm:$0xff]  }
 0xec9   : > { %v5999_v55 = vsel %vm3105_vm14, %v5317_v38, 128  ;;  %v3104_v11 = vpop.xlane.xlu0 %3103  ;;  %3551 = vmatpush1.bf16.msra.mxu1 %v4871_v24  ;;  %v4339_v24 = vld [vmem:[%s6106_s4] ss:$0 sm:$0xff] }
 0xeca   : > { %vm3106_vm15 = vcmp.ge.f32.partialorder %v3095_v31, %v3104_v11  ;;  %v3110_v34 = vshra.s32 %v5999_v55, 16  ;;  %v4882_v31 = vld [vmem:[#allocation2 + $0x18c] ss:$16 sps:$4 sm:$0xff]   ;;  %3552 = vmatprep.subr.bf16.mxu1 %v4879_v43  ;;  %v4885_v11 = vld [vmem:[#allocation2 + $0x1a4] ss:$16 sps:$4 sm:$0xff]   ;;  %v3109_v29 = vand.u32 65535, %v5999_v55 }
 0xecb   : > { %v6003_v36 = vsel %vm3106_vm15, %v5317_v38, 128  ;;  %3595 = vmatprep.subr.bf16.mxu0 %v4882_v31  ;;  %v4897_v55 = vld [vmem:[#allocation2 + $0x1e4] ss:$16 sps:$4 sm:$0xff]  }
 0xecc   : > { %v6005_v39 = vcvt.s32.f32 %v3110_v34  ;;  %v3124_v18 = vshra.s32 %v6003_v36, 16  ;;  %v4888_v34 = vld [vmem:[#allocation2 + $0x1ac] ss:$16 sps:$4 sm:$0xff]   ;;  %3596 = vmatpush1.bf16.msra.mxu0 %v4880_v32  ;;  %v3123_v30 = vand.u32 65535, %v6003_v36  ;;  %v3111_v40 = vcvt.s32.f32 %v3109_v29 }
 0xecd   : > { %3553 = vmatpush1.bf16.msra.mxu1 %v4877_v8  ;;  %3597 = vmatprep.subr.bf16.mxu0 %v4888_v34  ;;  %v4900_v36 = vld [vmem:[#allocation2 + $0x1ec] ss:$16 sps:$4 sm:$0xff]  }
 0xece   : > { %3113 = vmin.xlane.f32.xlu1 %v6005_v39  ;;  %v6009_v42 = vcvt.s32.f32 %v3124_v18  ;;  %v4883_v18 = vld [vmem:[#allocation2 + $0x1a0] ss:$16 sps:$4 sm:$0xff]   ;;  %3554 = vmatprep.subr.bf16.mxu1 %v4885_v11  ;;  %v3125_v17 = vcvt.s32.f32 %v3123_v30 }
 0xed0   : > { %3127 = vmin.xlane.f32.xlu0 %v6009_v42  ;;  %3598 = vmatpush1.bf16.msra.mxu0 %v4886_v28 }
 0xed1   : > { %3555 = vmatpush1.bf16.msra.mxu1 %v4883_v18  ;;  %3599 = vmatprep.subr.bf16.mxu0 %v4894_v12 }
 0xed2   : > { %3556 = vmatprep.subr.bf16.mxu1 %v4891_v9 }
 0xed4   : > { %3600 = vmatpush1.bf16.msra.mxu0 %v4892_v16 }
 0xed5   : > { %3557 = vmatpush1.bf16.msra.mxu1 %v4889_v14  ;;  %3601 = vmatprep.subr.bf16.mxu0 %v4900_v36 }
 0xed6   : > { %3558 = vmatprep.subr.bf16.mxu1 %v4897_v55 }
 0xed9   : > { %3559 = vmatpush1.bf16.msra.mxu1 %v4895_v19  ;;  %v4340_v19 = vld [vmem:[%s6108_s6] ss:$0 sm:$0xff] }
 0xeda   : > { %4489 = vmatprep.subr.bf16.mxu1 %v6151_v6 }
 0xf5b   : > { %v3114_v5 = vpop.xlane.xlu1 %3113 }
 0xf5c   : > { %vm3115_vm0 = vcmp.eq.f32.partialorder %v6005_v39, %v3114_v5  ;;  %v4898_v39 = vld [vmem:[#allocation2 + $0x1e8] ss:$16 sps:$4 sm:$0xff]  }
 0xf5d   : > { %v3128_v10 = vpop.xlane.xlu0 %3127  ;;  %v3116_v44 = vsel %vm3115_vm0, %v3111_v40, inf  ;;  %3602 = vmatpush1.bf16.msra.mxu0 %v4898_v39 }
 0xf5e   : > { %3117 = vmin.xlane.f32.xlu1 %v3116_v44  ;;  %vm3129_vm1 = vcmp.eq.f32.partialorder %v6009_v42, %v3128_v10  ;;  %v3120_v42 = vcvt.f32.s32 %v3114_v5  ;;  %v3134_v21 = vcvt.f32.s32 %v3128_v10 }
 0xf5f   : > { %v3130_v48 = vsel %vm3129_vm1, %v3125_v17, inf }
 0xf60   : > { %3131 = vmin.xlane.f32.xlu0 %v3130_v48  ;;  %v3121_v51 = vshll.u32 %v3120_v42, 16  ;;  %v3135_v58 = vshll.u32 %v3134_v21, 16 }
 0xfeb   : > { %v3118_v47 = vpop.xlane.xlu1 %3117 }
 0xfec   : > { %v3119_v53 = vcvt.f32.s32 %v3118_v47 }
 0xfed   : > { %v3132_v56 = vpop.xlane.xlu0 %3131 }
 0xfee   : > { %v3122_v60 = vadd.s32 %v3121_v51, %v3119_v53  ;;  %v3133_v13 = vcvt.f32.s32 %v3132_v56 }
 0xff0   : > { %v3136_v15 = vadd.s32 %v3135_v58, %v3133_v13  ;;  %vm3137_vm2 = vcmp.eq.s32.totalorder %v5317_v38, %v3122_v60 }
 0xff2   : > { %vm3138_vm3 = vcmp.eq.s32.totalorder %v5317_v38, %v3136_v15  ;;  %v4903_v38 = vld [vmem:[%s6107_s5 + $0x10] sm:$0xff]  }
 0xff3   : > { %vm4331_vm4 = vmpackc.low %vm3138_vm3, %vm3137_vm2 }
 0xff4   : > { %4332 = vmatmul.mubr.msk.bf16.vlgmr.msra.gmra.mrb[24].mxu1 %vm4331_vm4, %v6174_v35  ;;  %4334 = vmatmul.mubr.msk.bf16.vlgmr.msra.gmra.mrb[28].mxu0 %vm4331_vm4, %v6174_v35  ;;  %v4904_v35 = vld [vmem:[%s6107_s5 + $0x18] sm:$0xff]  }
 0xff5   : > { %4505 = vmatprep.mubr.msk.bf16.mxu1 %vm5083_vm7, %v6151_v6  ;;  %4490 = vmatpush3.bf16.msra.mxu1 %v4901_v20 }
 0xff6   : > { %4491 = vmatprep.subr.bf16.mxu1 %v6151_v6 }
 0xff9   : > { %4492 = vmatpush3.bf16.msra.mxu1 %v4902_v22 }
 0xffa   : > { %4493 = vmatprep.subr.bf16.mxu1 %v6151_v6 }
 0xffd   : > { %4494 = vmatpush3.bf16.msra.mxu1 %v4903_v38 }
 0xffe   : > { %4495 = vmatprep.subr.bf16.mxu1 %v6151_v6 }
0x1001   : > { %4496 = vmatpush3.bf16.msra.mxu1 %v4904_v35 }
0x1002   : > { %4497 = vmatprep.subr.bf16.mxu1 %v6151_v6 }
0x1005   : > { %4498 = vmatpush3.bf16.msra.mxu1 %v4905_v50 }
0x1006   : > { %4499 = vmatprep.subr.bf16.mxu1 %v6151_v6 }
0x1009   : > { %4500 = vmatpush3.bf16.msra.mxu1 %v4906_v52 }
0x100a   : > { %4501 = vmatprep.subr.bf16.mxu1 %v6151_v6 }
0x100d   : > { %4502 = vmatpush3.bf16.msra.mxu1 %v4907_v54 }
0x100e   : > { %4503 = vmatprep.subr.bf16.mxu1 %v6151_v6 }
0x1011   : > { %4504 = vmatpush3.bf16.msra.mxu1 %v4908_v57 }
0x10c7   : > { %v3562_v33 = vpop.f32.mrb[24].mxu1  ;;  %v3605_v59 = vpop.f32.mrb[28].mxu0 }
0x10c8   : > { %v4335_v61 = vmul.f32 -1.442695, %v3562_v33  ;;  %v3564_v62 = vpop.f32.mrb[25].mxu1  ;;  %v3607_v63 = vpop.f32.mrb[29].mxu0 }
0x10c9   : > { %v3566_v0 = vpop.f32.mrb[26].mxu1  ;;  %v3609_v1 = vpop.f32.mrb[30].mxu0  ;;  %v4337_v7 = vmul.f32 -1.442695, %v3564_v62  ;;  %v3645_v43 = vadd.f32 %v4339_v24, %v3607_v63 }
0x10ca   : > { %4989 = vpow2.f32 %v4335_v61  ;;  %v4336_v2 = vmul.f32 -1.442695, %v3566_v0  ;;  %v3568_v3 = vpop.f32.mrb[27].mxu1  ;;  %v3611_v4 = vpop.f32.mrb[31].mxu0 }
0x10cb   : > { %v4338_v37 = vmul.f32 -1.442695, %v3568_v3  ;;  %v3646_v11 = vadd.f32 %v4339_v24, %v3611_v4 }
0x10cc   : > { %4991 = vpow2.f32 %v4336_v2 }
0x10cd   : > { %4993 = vpow2.f32 %v4337_v7 }
0x10ce   : > { %4995 = vpow2.f32 %v4338_v37 }
0x10d4   : > { %v4990_v41 = vpop.eup %4989 }
0x10d5   : > { %v3620_v46 = vadd.f32 1.0, %v4990_v41 }
0x10d6   : > { %v4992_v6 = vpop.eup %4991 }
0x10d7   : > { %4997 = vrcp.f32 %v3620_v46  ;;  %v3621_v45 = vadd.f32 1.0, %v4992_v6  ;;  %v4994_v26 = vpop.eup %4993 }
0x10d8   : > { %v4996_v27 = vpop.eup %4995  ;;  %v3632_v25 = vadd.f32 1.0, %v4994_v26 }
0x10d9   : > { %4999 = vrcp.f32 %v3621_v45  ;;  %v3633_v31 = vadd.f32 1.0, %v4996_v27 }
0x10da   : > { %5001 = vrcp.f32 %v3632_v25 }
0x10db   : > { %5003 = vrcp.f32 %v3633_v31 }
0x10e1   : > { %v4998_v8 = vpop.eup %4997 }
0x10e2   : > { %v3647_v32 = vmul.f32 %v4998_v8, %v3645_v43 }
0x10e3   : > { %v5000_v34 = vpop.eup %4999 }
0x10e4   : > { %v3649_v18 = vadd.f32 %v3647_v32, %v3605_v59  ;;  %v3648_v28 = vmul.f32 %v5000_v34, %v3646_v11  ;;  %v5002_v30 = vpop.eup %5001 }
0x10e5   : > { %v5004_v5 = vpop.eup %5003  ;;  %v3653_v40 = vsub.f32 1.0, %v5002_v30  ;;  %v3657_v48 = vmul.f32 %v5002_v30, %v5988_v49 }
0x10e6   : > { %5005 = vtanh.f32 %v3649_v18  ;;  %v3650_v29 = vadd.f32 %v3648_v28, %v3609_v1  ;;  %v3654_v44 = vsub.f32 1.0, %v5004_v5  ;;  %v3658_v14 = vmul.f32 %v5004_v5, %v5990_v23 }
0x10e8   : > { %5007 = vtanh.f32 %v3650_v29 }
0x10f0   : > { %v5006_v10 = vpop.eup %5005 }
0x10f1   : > { %v3655_v17 = vmul.f32 %v5006_v10, %v3653_v40 }
0x10f2   : > { %v5008_v9 = vpop.eup %5007 }
0x10f3   : > { %v3656_v12 = vmul.f32 %v5008_v9, %v3654_v44  ;;  %v3659_v16 = vadd.f32 %v3657_v48, %v3655_v17 }
0x10f5   : > { %v3660_v55 = vadd.f32 %v3658_v14, %v3656_v12 }
0x10f7   : > { %v3661_v36 = vpack.c.bf16 %v3660_v55, %v3659_v16 }
0x10f9   : > { %4506 = vmatmul.mubr.bf16.vlgmr.msra.gmra.mrb[28].mxu1 %v3661_v36 }
0x11cc   : > { %v3767_v39 = vpop.f32.mrb[28].mxu1 }
0x11cd   : > { %v3768_v42 = vadd.f32 %v4340_v19, %v3767_v39  ;;  %v4507_v21 = vpop.f32.mrb[29].mxu1 }
0x11ce   : > { %v3770_v47 = vpop.f32.mrb[30].mxu1 }
0x11cf   : > { %4349 = vst [vmem:[%s5417_s14 + $0x50] sm:$0xff] %v3768_v42  ;;  %v3771_v49 = vadd.f32 %v4340_v19, %v3770_v47  ;;  %v4508_v51 = vpop.f32.mrb[31].mxu1 }
0x11d1   : > { %4350 = vst [vmem:[%s5417_s14 + $0x58] sm:$0xff] %v3771_v49 }
0x11d2   : > { %s4355_s23 = sshll.u32 %s5152_s28, 8  ;;  %s3807_s29 = sshll.u32 %s5417_s14, 4  ;;  %s3808_s29 = int_to_ptr.vmem [resolvable:$true] %s3807_s29 }
0x11d3   : > { %s3790_s18 = scalar_lea.hbm %s6109_s7, %s4355_s23  ;;  %s5084_s16 = smov 256  }
0x11d4   : > { %p6192_p6 = scmp.ne.s32.totalorder %s6139_s11, 0  ;;  %s5085_s8 = smov 512  }
0x11d5   : > { %s5086_s19 = smov 2   ;;  %s5087_s20 = smov 128  }
0x11d6   : > { %4514 = sst [smem:[#allocation7]] (%p6192_p6), %s5084_s16  ;;  %s5088_s28 = smov 8  }
0x11d7   : > { %4515 = sst [smem:[#allocation7 + $0x1]] (%p6192_p6), %s5085_s8  ;;  %s5089_s14 = smov [#allocation6]  }
0x11d8   : > { %4516 = sst [smem:[#allocation7 + $0x2]] (%p6192_p6), %s5086_s19  ;;  %s5090_s15 = smov 0  }
0x11d9   : > { %4517 = sst [smem:[#allocation7 + $0x3]] (%p6192_p6), %s5087_s20 }
0x11da   : > { %4518 = sst [smem:[#allocation7 + $0x4]] (%p6192_p6), %s5087_s20 }
0x11db   : > { %4519 = sst [smem:[#allocation7 + $0x5]] (%p6192_p6), %s5088_s28 }
0x11dc   : > { %4520 = dma.general (%p6192_p6), %s3808_s29, 1536, %s3790_s18, %s3778_s22, %s5089_s14, [#allocation7], %s5090_s15, 0  }
0x11dd PF: > { %p4532_p9 = scmp.ge.s32.totalorder %s5075_s27, 2  ;;  %s3835_s13 = sand.u32 1, %s5063_s24  }
0x11de   : > { %p6193_p10 = scmp.ne.s32.totalorder %s6140_s12, 0  ;;  %s3836_s21 = scalar_lea.sflag [#allocation4], %s3835_s13 }
0x11e0   : > { %p4527_p12 = pnand %p4532_p9, %p6193_p10 }
0x11e2   : > { %5058 = dma.done.wait (!%p4527_p12), %s3836_s21, 1536  }
0x11e3   : > { %5060 = vsyncadd (!%p4527_p12), %s3836_s21, 4294965760  ;;  %p18_p2 = scmp.ge.s32.totalorder %s5156_s30, 4   ;;  %s6194_s24 = smov %s5067_s25 }
0x11e4   : > { %s6195_s25 = smov %s5071_s26  ;;  %s6196_s26 = smov %s5167_s10 }
0x11e5   : > { %s6197_s27 = smov %s5156_s30  ;;  %20 = sbr.rel (!%p18_p2) target bundleno = 4 (0x4), region = 101 }
0x11ec   :  { %3841 = vsyncpa [#allocation3], 1 }
0x11ed   :  { %3843 = vsyncpa [#allocation3 + $0x1], 1 }
0x11ee   :  { %3844 = vsyncpa [#allocation4], 1 }
0x11ef   :  { %3846 = vsyncpa [#allocation4 + $0x1], 1 }

</bundles_post_ra>
